<compile_context>
chip_gen: v6e
topology: v6e:2x2x1
jax: 0.10.0
libtpu: 0.0.40
codegen_flags: <defaults>
</compile_context>

<pallas_src>
import jax
import jax.numpy as jnp
from jax.experimental import pallas as pl
from jax.experimental.pallas import tpu as pltpu


# Logical layer widths.
DIMS = [784, 256, 64, 20, 64, 256, 784]
# Padded weight shapes used inside the kernel: first/last feature dims stay at
# the true 784 (full-array last dim => legal block); tiny middle dims are
# zero-padded to 128 so intermediate activations are lane-dense.
IN_PAD = [784, 256, 128, 128, 128, 256]
OUT_PAD = [256, 128, 128, 128, 256, 784]
BIAS_ROWS = 8  # sublane-aligned bias slab: 6 bias rows + 2 zero rows


def _round_up(x, m):
    return ((x + m - 1) // m) * m


def _cdiv(a, b):
    return -(-a // b)


# ----------------------------- Pallas kernel ------------------------------ #
def ae_kernel(x_ref, w1, w2, w3, w4, w5, w6, b_ref, o_ref):
    """Full 6-layer autoencoder forward for one (TILE_B, 784) batch tile.

    Matmuls run in the weight dtype (bf16 by default) with f32 accumulation;
    bias-add / ReLU / sigmoid epilogues are f32.  Zero-padded weight rows/cols
    and zero bias padding keep padded lanes exactly zero through the ReLU
    chain, so the math matches the unpadded network.
    """
    cdt = w1.dtype

    def layer(h, w_ref, row, width, relu):
        z = jnp.dot(h.astype(cdt), w_ref[...],
                    preferred_element_type=jnp.float32)
        z = z + b_ref[row:row + 1, :width]
        return jnp.maximum(z, 0.0) if relu else z

    h = x_ref[...]                              # (TILE_B, 784), compute dtype
    h = layer(h, w1, 0, OUT_PAD[0], True)       # 784 -> 256
    h = layer(h, w2, 1, OUT_PAD[1], True)       # 256 -> 128 (real 64)
    h = layer(h, w3, 2, OUT_PAD[2], True)       # 128 -> 128 (real 20)
    h = layer(h, w4, 3, OUT_PAD[3], True)       # 128 -> 128 (real 64)
    h = layer(h, w5, 4, OUT_PAD[4], True)       # 128 -> 256
    z = layer(h, w6, 5, OUT_PAD[5], False)      # 256 -> 784
    o_ref[...] = jax.nn.sigmoid(z)              # f32 epilogue


# --------------------------- parameter packing ----------------------------- #
def prepare_params(params, compute_dtype=jnp.bfloat16):
    """One-time packing (hoisted out of the per-call path).

    Zero-pads each (in, out) weight to the kernel layout and casts to the
    compute dtype; packs the six biases into a single (8, 784) f32 slab with
    one pad+stack (no per-row scatters).
    """
    ws, brows = [], []
    for i, (w, b) in enumerate(params):
        wp = jnp.pad(w, ((0, IN_PAD[i] - w.shape[0]),
                         (0, OUT_PAD[i] - w.shape[1])))
        ws.append(wp.astype(compute_dtype))
        brows.append(jnp.pad(b.astype(jnp.float32), (0, DIMS[-1] - b.shape[0])))
    brows += [jnp.zeros((DIMS[-1],), jnp.float32)] * (BIAS_ROWS - len(brows))
    return tuple(ws), jnp.stack(brows)


# ------------------------------- wrapper ---------------------------------- #
@jax.jit
def encoder_decoder(x, packed):
    """x: (B, 1, 28, 28) float -> (B, 1, 28, 28) float32."""
    ws, b_all = packed
    cdt = ws[0].dtype
    B = x.shape[0]
    x_flat = x.reshape(B, DIMS[0]).astype(cdt)

    # Batch tiling: large tiles amortize the serial 6-matmul chain and the
    # ~0.35us/step grid overhead (bf16 up to 1024 rows, f32 up to 512).  For
    # large batches force >= 2 grid steps so both v7x TensorCores get work,
    # and balance the tile so row-padding waste is < 8 rows per tile.
    max_tile = 1024 if cdt == jnp.bfloat16 else 512
    b8 = _round_up(B, 8)
    n_tiles = _cdiv(b8, max_tile)
    if b8 >= 512:                      # megacore: guarantee work for 2nd TC
        n_tiles = max(n_tiles, 2)
    tile_b = _round_up(_cdiv(b8, n_tiles), 8)
    b_pad = n_tiles * tile_b

    if b_pad > B:                      # row-only pad (no feature-dim pad)
        x_flat = jnp.pad(x_flat, ((0, b_pad - B), (0, 0)))

    x_spec = pl.BlockSpec((tile_b, DIMS[0]), lambda g: (g, 0))
    o_spec = pl.BlockSpec((tile_b, DIMS[-1]), lambda g: (g, 0))
    # Constant block index -> weights/bias fetched once, stay VMEM resident.
    w_specs = [pl.BlockSpec(w.shape, lambda g: (0, 0)) for w in ws]
    b_spec = pl.BlockSpec((BIAS_ROWS, DIMS[-1]), lambda g: (0, 0))

    out_pad = pl.pallas_call(
        ae_kernel,
        out_shape=jax.ShapeDtypeStruct((b_pad, DIMS[-1]), jnp.float32),
        grid=(n_tiles,),
        in_specs=[x_spec] + w_specs + [b_spec],
        out_specs=o_spec,
        compiler_params=pltpu.CompilerParams(
            dimension_semantics=("parallel",),   # megacore sharding on v7x
            vmem_limit_bytes=48 << 20,           # fits v7x 64 MiB physical
        ),
    )(x_flat, *ws, b_all)

    return out_pad[:B].reshape(B, 1, 28, 28)


# ----------------------- deterministic parameter init --------------------- #
def init_params(key):
    """PyTorch nn.Linear-style U(-1/sqrt(fan_in), 1/sqrt(fan_in)) init.

    Weights are stored transposed relative to PyTorch, i.e. (in, out), so the
    kernel computes x @ W + b (== x @ W_pt.T + b_pt).
    """
    dims = [(784, 256), (256, 64), (64, 20),    # encoder
            (20, 64), (64, 256), (256, 784)]    # decoder
    params = []
    for (fan_in, fan_out) in dims:
        key, kw, kb = jax.random.split(key, 3)
        bound = 1.0 / jnp.sqrt(float(fan_in))
        w = jax.random.uniform(kw, (fan_in, fan_out), jnp.float32, -bound, bound)
        b = jax.random.uniform(kb, (fan_out,), jnp.float32, -bound, bound)
        params.append((w, b))
    return params


# --------------------------- pure-JAX reference ---------------------------- #
def reference(x, params):
    B = x.shape[0]
    h = x.reshape(B, 784).astype(jnp.float32)
    for i, (w, b) in enumerate(params):
        h = h @ w + b
        h = jax.nn.sigmoid(h) if i == len(params) - 1 else jnp.maximum(h, 0.0)
    return h.reshape(B, 1, 28, 28)


if __name__ == "__main__":
    key = jax.random.PRNGKey(0)
    key, kx, kx2, kx3 = jax.random.split(key, 4)
    params = init_params(key)

    packed_bf16 = prepare_params(params, jnp.bfloat16)   # default fast path
    packed_f32 = prepare_params(params, jnp.float32)     # exactness check

    # Primary small test: B = 2.
    B = 2
    x = jax.random.normal(kx, (B, 1, 28, 28), dtype=jnp.float32)
    ref = reference(x, params)

    out_f32 = jax.block_until_ready(encoder_decoder(x, packed_f32))
    assert out_f32.shape == (B, 1, 28, 28), out_f32.shape
    assert jnp.allclose(out_f32, ref, atol=2e-5, rtol=2e-5), "f32 path mismatch (B=2)"

    out_bf16 = jax.block_until_ready(encoder_decoder(x, packed_bf16))
    assert out_bf16.shape == (B, 1, 28, 28), out_bf16.shape
    assert jnp.allclose(out_bf16, ref, atol=2e-2, rtol=2e-2), "bf16 path mismatch (B=2)"

    # Batch-row-padding path (B not a multiple of 8).
    B2 = 20
    x2 = jax.random.normal(kx2, (B2, 1, 28, 28), dtype=jnp.float32)
    out2 = jax.block_until_ready(encoder_decoder(x2, packed_bf16))
    assert out2.shape == (B2, 1, 28, 28), out2.shape
    assert jnp.allclose(out2, reference(x2, params), atol=2e-2, rtol=2e-2), \
        "bf16 path mismatch (B=20)"

    # Multi-tile grid path (>= 2 grid steps; exercises the megacore split).
    B3 = 520
    x3 = jax.random.normal(kx3, (B3, 1, 28, 28), dtype=jnp.float32)
    out3 = jax.block_until_ready(encoder_decoder(x3, packed_bf16))
    assert out3.shape == (B3, 1, 28, 28), out3.shape
    assert jnp.allclose(out3, reference(x3, params), atol=2e-2, rtol=2e-2), \
        "bf16 path mismatch (B=520)"

    print("KERNEL_OK")
</pallas_src>

<mosaic_0001>
module attributes {stable_mosaic.version = 11 : i64} {
  func.func @ae_kernel(%arg0: i32, %arg1: memref<8x784xf32, #tpu.memory_space<vmem>>, %arg2: memref<784x256xf32, #tpu.memory_space<vmem>>, %arg3: memref<256x128xf32, #tpu.memory_space<vmem>>, %arg4: memref<128x128xf32, #tpu.memory_space<vmem>>, %arg5: memref<128x128xf32, #tpu.memory_space<vmem>>, %arg6: memref<128x256xf32, #tpu.memory_space<vmem>>, %arg7: memref<256x784xf32, #tpu.memory_space<vmem>>, %arg8: memref<8x784xf32, #tpu.memory_space<vmem>>, %arg9: memref<8x784xf32, #tpu.memory_space<vmem>>) attributes {dimension_semantics = [#tpu.dimension_semantics<parallel>], iteration_bounds = array<i64: 1>, scalar_prefetch = 0 : i64, scratch_operands = 0 : i64, tpu.core_type = #tpu.core_type<tc>, window_params = [{transform_indices = @transform_0, window_bounds = array<i64: 8, 784>}, {pipeline_mode = #tpu.pipeline_mode<synchronous>, transform_indices = @transform_1, window_bounds = array<i64: 784, 256>}, {pipeline_mode = #tpu.pipeline_mode<synchronous>, transform_indices = @transform_2, window_bounds = array<i64: 256, 128>}, {pipeline_mode = #tpu.pipeline_mode<synchronous>, transform_indices = @transform_3, window_bounds = array<i64: 128, 128>}, {pipeline_mode = #tpu.pipeline_mode<synchronous>, transform_indices = @transform_4, window_bounds = array<i64: 128, 128>}, {pipeline_mode = #tpu.pipeline_mode<synchronous>, transform_indices = @transform_5, window_bounds = array<i64: 128, 256>}, {pipeline_mode = #tpu.pipeline_mode<synchronous>, transform_indices = @transform_6, window_bounds = array<i64: 256, 784>}, {pipeline_mode = #tpu.pipeline_mode<synchronous>, transform_indices = @transform_7, window_bounds = array<i64: 8, 784>}, {transform_indices = @transform_8, window_bounds = array<i64: 8, 784>}]} {
    %c0 = arith.constant 0 : index
    %c0_0 = arith.constant 0 : index
    %0 = vector.load %arg1[%c0, %c0_0] : memref<8x784xf32, #tpu.memory_space<vmem>>, vector<8x784xf32>
    %c0_1 = arith.constant 0 : index
    %c0_2 = arith.constant 0 : index
    %1 = vector.load %arg2[%c0_1, %c0_2] : memref<784x256xf32, #tpu.memory_space<vmem>>, vector<784x256xf32>
    %cst = arith.constant dense<0.000000e+00> : vector<8x256xf32>
    %2 = tpu.matmul %0, %1, %cst {dimension_numbers = #tpu.dot_dimension_numbers<[1], [0], [0], [1], [0, 0, 1, 1], [], []>} : vector<8x784xf32>, vector<784x256xf32>, vector<8x256xf32> -> vector<8x256xf32>
    %c0_3 = arith.constant 0 : index
    %c0_4 = arith.constant 0 : index
    %3 = vector.load %arg8[%c0_3, %c0_4] : memref<8x784xf32, #tpu.memory_space<vmem>>, vector<1x256xf32>
    %4 = vector.broadcast %3 : vector<1x256xf32> to vector<8x256xf32>
    %5 = arith.addf %2, %4 : vector<8x256xf32>
    %cst_5 = arith.constant 0.000000e+00 : f32
    %6 = vector.broadcast %cst_5 : f32 to vector<8x256xf32>
    %7 = arith.maximumf %5, %6 : vector<8x256xf32>
    %c0_6 = arith.constant 0 : index
    %c0_7 = arith.constant 0 : index
    %8 = vector.load %arg3[%c0_6, %c0_7] : memref<256x128xf32, #tpu.memory_space<vmem>>, vector<256x128xf32>
    %cst_8 = arith.constant dense<0.000000e+00> : vector<8x128xf32>
    %9 = tpu.matmul %7, %8, %cst_8 {dimension_numbers = #tpu.dot_dimension_numbers<[1], [0], [0], [1], [0, 0, 1, 1], [], []>} : vector<8x256xf32>, vector<256x128xf32>, vector<8x128xf32> -> vector<8x128xf32>
    %c1 = arith.constant 1 : index
    %c0_9 = arith.constant 0 : index
    %10 = vector.load %arg8[%c1, %c0_9] : memref<8x784xf32, #tpu.memory_space<vmem>>, vector<1x128xf32>
    %11 = vector.broadcast %10 : vector<1x128xf32> to vector<8x128xf32>
    %12 = arith.addf %9, %11 : vector<8x128xf32>
    %cst_10 = arith.constant 0.000000e+00 : f32
    %13 = vector.broadcast %cst_10 : f32 to vector<8x128xf32>
    %14 = arith.maximumf %12, %13 : vector<8x128xf32>
    %c0_11 = arith.constant 0 : index
    %c0_12 = arith.constant 0 : index
    %15 = vector.load %arg4[%c0_11, %c0_12] : memref<128x128xf32, #tpu.memory_space<vmem>>, vector<128x128xf32>
    %cst_13 = arith.constant dense<0.000000e+00> : vector<8x128xf32>
    %16 = tpu.matmul %14, %15, %cst_13 {dimension_numbers = #tpu.dot_dimension_numbers<[1], [0], [0], [1], [0, 0, 1, 1], [], []>} : vector<8x128xf32>, vector<128x128xf32>, vector<8x128xf32> -> vector<8x128xf32>
    %c2 = arith.constant 2 : index
    %c0_14 = arith.constant 0 : index
    %17 = vector.load %arg8[%c2, %c0_14] : memref<8x784xf32, #tpu.memory_space<vmem>>, vector<1x128xf32>
    %18 = vector.broadcast %17 : vector<1x128xf32> to vector<8x128xf32>
    %19 = arith.addf %16, %18 : vector<8x128xf32>
    %cst_15 = arith.constant 0.000000e+00 : f32
    %20 = vector.broadcast %cst_15 : f32 to vector<8x128xf32>
    %21 = arith.maximumf %19, %20 : vector<8x128xf32>
    %c0_16 = arith.constant 0 : index
    %c0_17 = arith.constant 0 : index
    %22 = vector.load %arg5[%c0_16, %c0_17] : memref<128x128xf32, #tpu.memory_space<vmem>>, vector<128x128xf32>
    %cst_18 = arith.constant dense<0.000000e+00> : vector<8x128xf32>
    %23 = tpu.matmul %21, %22, %cst_18 {dimension_numbers = #tpu.dot_dimension_numbers<[1], [0], [0], [1], [0, 0, 1, 1], [], []>} : vector<8x128xf32>, vector<128x128xf32>, vector<8x128xf32> -> vector<8x128xf32>
    %c3 = arith.constant 3 : index
    %c0_19 = arith.constant 0 : index
    %24 = vector.load %arg8[%c3, %c0_19] : memref<8x784xf32, #tpu.memory_space<vmem>>, vector<1x128xf32>
    %25 = vector.broadcast %24 : vector<1x128xf32> to vector<8x128xf32>
    %26 = arith.addf %23, %25 : vector<8x128xf32>
    %cst_20 = arith.constant 0.000000e+00 : f32
    %27 = vector.broadcast %cst_20 : f32 to vector<8x128xf32>
    %28 = arith.maximumf %26, %27 : vector<8x128xf32>
    %c0_21 = arith.constant 0 : index
    %c0_22 = arith.constant 0 : index
    %29 = vector.load %arg6[%c0_21, %c0_22] : memref<128x256xf32, #tpu.memory_space<vmem>>, vector<128x256xf32>
    %cst_23 = arith.constant dense<0.000000e+00> : vector<8x256xf32>
    %30 = tpu.matmul %28, %29, %cst_23 {dimension_numbers = #tpu.dot_dimension_numbers<[1], [0], [0], [1], [0, 0, 1, 1], [], []>} : vector<8x128xf32>, vector<128x256xf32>, vector<8x256xf32> -> vector<8x256xf32>
    %c4 = arith.constant 4 : index
    %c0_24 = arith.constant 0 : index
    %31 = vector.load %arg8[%c4, %c0_24] : memref<8x784xf32, #tpu.memory_space<vmem>>, vector<1x256xf32>
    %32 = vector.broadcast %31 : vector<1x256xf32> to vector<8x256xf32>
    %33 = arith.addf %30, %32 : vector<8x256xf32>
    %cst_25 = arith.constant 0.000000e+00 : f32
    %34 = vector.broadcast %cst_25 : f32 to vector<8x256xf32>
    %35 = arith.maximumf %33, %34 : vector<8x256xf32>
    %c0_26 = arith.constant 0 : index
    %c0_27 = arith.constant 0 : index
    %36 = vector.load %arg7[%c0_26, %c0_27] : memref<256x784xf32, #tpu.memory_space<vmem>>, vector<256x784xf32>
    %cst_28 = arith.constant dense<0.000000e+00> : vector<8x784xf32>
    %37 = tpu.matmul %35, %36, %cst_28 {dimension_numbers = #tpu.dot_dimension_numbers<[1], [0], [0], [1], [0, 0, 1, 1], [], []>} : vector<8x256xf32>, vector<256x784xf32>, vector<8x784xf32> -> vector<8x784xf32>
    %c5 = arith.constant 5 : index
    %c0_29 = arith.constant 0 : index
    %38 = vector.load %arg8[%c5, %c0_29] : memref<8x784xf32, #tpu.memory_space<vmem>>, vector<1x784xf32>
    %39 = vector.broadcast %38 : vector<1x784xf32> to vector<8x784xf32>
    %40 = arith.addf %37, %39 : vector<8x784xf32>
    %41 = arith.negf %40 : vector<8x784xf32>
    %42 = math.exp %41 : vector<8x784xf32>
    %cst_30 = arith.constant 1.000000e+00 : f32
    %43 = vector.broadcast %cst_30 : f32 to vector<8x784xf32>
    %44 = arith.addf %43, %42 : vector<8x784xf32>
    %45 = arith.divf %43, %44 : vector<8x784xf32>
    %c0_31 = arith.constant 0 : index
    %c0_32 = arith.constant 0 : index
    %46 = vector.load %arg9[%c0_31, %c0_32] : memref<8x784xf32, #tpu.memory_space<vmem>>, vector<8x784xf32>
    tpu.vector_store %arg9[%c0_31, %c0_32], %45 {strides = array<i32>} : memref<8x784xf32, #tpu.memory_space<vmem>>, vector<8x784xf32>,
    return
  }
  func.func @transform_0(%arg0: i32) -> (i32, i32) {
    %c0_i32 = arith.constant 0 : i32
    %c0_i32_0 = arith.constant 0 : i32
    return %arg0, %c0_i32 : i32, i32
  }
  func.func @transform_1(%arg0: i32) -> (i32, i32) {
    %c0_i32 = arith.constant 0 : i32
    %c0_i32_0 = arith.constant 0 : i32
    %c0_i32_1 = arith.constant 0 : i32
    return %c0_i32, %c0_i32_0 : i32, i32
  }
  func.func @transform_2(%arg0: i32) -> (i32, i32) {
    %c0_i32 = arith.constant 0 : i32
    %c0_i32_0 = arith.constant 0 : i32
    %c0_i32_1 = arith.constant 0 : i32
    return %c0_i32, %c0_i32_0 : i32, i32
  }
  func.func @transform_3(%arg0: i32) -> (i32, i32) {
    %c0_i32 = arith.constant 0 : i32
    %c0_i32_0 = arith.constant 0 : i32
    %c0_i32_1 = arith.constant 0 : i32
    return %c0_i32, %c0_i32_0 : i32, i32
  }
  func.func @transform_4(%arg0: i32) -> (i32, i32) {
    %c0_i32 = arith.constant 0 : i32
    %c0_i32_0 = arith.constant 0 : i32
    %c0_i32_1 = arith.constant 0 : i32
    return %c0_i32, %c0_i32_0 : i32, i32
  }
  func.func @transform_5(%arg0: i32) -> (i32, i32) {
    %c0_i32 = arith.constant 0 : i32
    %c0_i32_0 = arith.constant 0 : i32
    %c0_i32_1 = arith.constant 0 : i32
    return %c0_i32, %c0_i32_0 : i32, i32
  }
  func.func @transform_6(%arg0: i32) -> (i32, i32) {
    %c0_i32 = arith.constant 0 : i32
    %c0_i32_0 = arith.constant 0 : i32
    %c0_i32_1 = arith.constant 0 : i32
    return %c0_i32, %c0_i32_0 : i32, i32
  }
  func.func @transform_7(%arg0: i32) -> (i32, i32) {
    %c0_i32 = arith.constant 0 : i32
    %c0_i32_0 = arith.constant 0 : i32
    %c0_i32_1 = arith.constant 0 : i32
    return %c0_i32, %c0_i32_0 : i32, i32
  }
  func.func @transform_8(%arg0: i32) -> (i32, i32) {
    %c0_i32 = arith.constant 0 : i32
    %c0_i32_0 = arith.constant 0 : i32
    return %arg0, %c0_i32 : i32, i32
  }
}

</mosaic_0001>

<bundles_post_ra>
// kernel: encoder_decoder.1
= control target key start
LH: loop header
LB: loop body
LE: loop exit
PB: predicated region body
PF: predicated region fallthrough
CT: control target
= control target key end

     0   :  { %vm244_vm0 = vcmask 130048   ;;  %vm1748_vm1 = vmmov 0   ;;  %s3468_s1 = inlined_call_operand.vmem [shape: f32[784,256], index: 1, kind: input, shape index: {}]   ;;  %s3469_s0 = inlined_call_operand.vmem [shape: f32[8,784], index: 0, kind: input, shape index: {}]   ;;  %s3470_s2 = inlined_call_operand.vmem [shape: f32[256,128], index: 2, kind: input, shape index: {}]   ;;  %s3471_s7 = inlined_call_operand.vmem [shape: f32[8,784], index: 7, kind: input, shape index: {}]   ;;  %s3472_s3 = inlined_call_operand.vmem [shape: f32[128,128], index: 3, kind: input, shape index: {}]   ;;  %s3473_s4 = inlined_call_operand.vmem [shape: f32[128,128], index: 4, kind: input, shape index: {}]   ;;  %s3474_s5 = inlined_call_operand.vmem [shape: f32[128,256], index: 5, kind: input, shape index: {}]   ;;  %s3475_s6 = inlined_call_operand.vmem [shape: f32[256,784], index: 6, kind: input, shape index: {}]   ;;  %s3476_s8 = inlined_call_operand.vmem [shape: f32[8,784], index: 8, kind: output, shape index: {}]  }
   0x1   :  { %v67_v0 = vld [vmem:[%s3468_s1 + $0xf8] sm:$0xff]  ;;  %v66_v1 = vld [vmem:[%s3468_s1 + $0xf0] sm:$0xff]  ;;  %v65_v2 = vld [vmem:[%s3468_s1 + $0xe8] sm:$0xff] }
   0x2   :  { %248 = vmatprep.subr.mxu0 %v67_v0  ;;  %v131_v3 = vld [vmem:[%s3468_s1 + $0x2f8] sm:$0xff]  ;;  %v64_v4 = vld [vmem:[%s3468_s1 + $0xe0] sm:$0xff]  ;;  %v130_v5 = vld [vmem:[%s3468_s1 + $0x2f0] sm:$0xff] }
   0x3   :  { %249 = vmatpush1.msra.mxu0 %v66_v1  ;;  %319 = vmatprep.subr.mxu1 %v131_v3  ;;  %v63_v6 = vld [vmem:[%s3468_s1 + $0xd8] sm:$0xff]  ;;  %v129_v7 = vld [vmem:[%s3468_s1 + $0x2e8] sm:$0xff]  ;;  %v62_v8 = vld [vmem:[%s3468_s1 + $0xd0] sm:$0xff] }
   0x4   :  { %250 = vmatprep.subr.mxu0 %v65_v2  ;;  %320 = vmatpush1.msra.mxu1 %v130_v5  ;;  %v128_v9 = vld [vmem:[%s3468_s1 + $0x2e0] sm:$0xff]  ;;  %v127_v10 = vld [vmem:[%s3468_s1 + $0x2d8] sm:$0xff]  ;;  %v61_v11 = vld [vmem:[%s3468_s1 + $0xc8] sm:$0xff] }
   0x5   :  { %251 = vmatpush1.msra.mxu0 %v64_v4  ;;  %321 = vmatprep.subr.mxu1 %v129_v7  ;;  %v126_v12 = vld [vmem:[%s3468_s1 + $0x2d0] sm:$0xff]  ;;  %v60_v13 = vld [vmem:[%s3468_s1 + $0xc0] sm:$0xff]  ;;  %v125_v14 = vld [vmem:[%s3468_s1 + $0x2c8] sm:$0xff] }
   0x6   :  { %252 = vmatprep.subr.mxu0 %v63_v6  ;;  %322 = vmatpush1.msra.mxu1 %v128_v9  ;;  %v59_v15 = vld [vmem:[%s3468_s1 + $0xb8] sm:$0xff]  ;;  %v124_v16 = vld [vmem:[%s3468_s1 + $0x2c0] sm:$0xff]  ;;  %v58_v17 = vld [vmem:[%s3468_s1 + $0xb0] sm:$0xff] }
   0x7   :  { %253 = vmatpush1.msra.mxu0 %v62_v8  ;;  %323 = vmatprep.subr.mxu1 %v127_v10  ;;  %v123_v18 = vld [vmem:[%s3468_s1 + $0x2b8] sm:$0xff]  ;;  %v57_v19 = vld [vmem:[%s3468_s1 + $0xa8] sm:$0xff]  ;;  %v122_v20 = vld [vmem:[%s3468_s1 + $0x2b0] sm:$0xff] }
   0x8   :  { %254 = vmatprep.subr.mxu0 %v61_v11  ;;  %324 = vmatpush1.msra.mxu1 %v126_v12  ;;  %v56_v21 = vld [vmem:[%s3468_s1 + $0xa0] sm:$0xff]  ;;  %v121_v22 = vld [vmem:[%s3468_s1 + $0x2a8] sm:$0xff]  ;;  %v55_v23 = vld [vmem:[%s3468_s1 + $0x98] sm:$0xff] }
   0x9   :  { %255 = vmatpush1.msra.mxu0 %v60_v13  ;;  %325 = vmatprep.subr.mxu1 %v125_v14  ;;  %v120_v24 = vld [vmem:[%s3468_s1 + $0x2a0] sm:$0xff]  ;;  %v54_v25 = vld [vmem:[%s3468_s1 + $0x90] sm:$0xff]  ;;  %v119_v26 = vld [vmem:[%s3468_s1 + $0x298] sm:$0xff] }
   0xa   :  { %256 = vmatprep.subr.mxu0 %v59_v15  ;;  %326 = vmatpush1.msra.mxu1 %v124_v16  ;;  %v53_v27 = vld [vmem:[%s3468_s1 + $0x88] sm:$0xff]  ;;  %v118_v28 = vld [vmem:[%s3468_s1 + $0x290] sm:$0xff]  ;;  %v52_v29 = vld [vmem:[%s3468_s1 + $0x80] sm:$0xff] }
   0xb   :  { %257 = vmatpush1.msra.mxu0 %v58_v17  ;;  %327 = vmatprep.subr.mxu1 %v123_v18  ;;  %v117_v30 = vld [vmem:[%s3468_s1 + $0x288] sm:$0xff]  ;;  %v51_v31 = vld [vmem:[%s3468_s1 + $0x78] sm:$0xff]  ;;  %v116_v32 = vld [vmem:[%s3468_s1 + $0x280] sm:$0xff] }
   0xc   :  { %258 = vmatprep.subr.mxu0 %v57_v19  ;;  %328 = vmatpush1.msra.mxu1 %v122_v20  ;;  %v50_v33 = vld [vmem:[%s3468_s1 + $0x70] sm:$0xff]  ;;  %v115_v34 = vld [vmem:[%s3468_s1 + $0x278] sm:$0xff]  ;;  %v49_v35 = vld [vmem:[%s3468_s1 + $0x68] sm:$0xff] }
   0xd   :  { %259 = vmatpush1.msra.mxu0 %v56_v21  ;;  %329 = vmatprep.subr.mxu1 %v121_v22  ;;  %v114_v36 = vld [vmem:[%s3468_s1 + $0x270] sm:$0xff]  ;;  %v48_v37 = vld [vmem:[%s3468_s1 + $0x60] sm:$0xff]  ;;  %v113_v38 = vld [vmem:[%s3468_s1 + $0x268] sm:$0xff] }
   0xe   :  { %260 = vmatprep.subr.mxu0 %v55_v23  ;;  %330 = vmatpush1.msra.mxu1 %v120_v24  ;;  %v47_v39 = vld [vmem:[%s3468_s1 + $0x58] sm:$0xff]  ;;  %v112_v40 = vld [vmem:[%s3468_s1 + $0x260] sm:$0xff]  ;;  %v46_v41 = vld [vmem:[%s3468_s1 + $0x50] sm:$0xff] }
   0xf   :  { %261 = vmatpush1.msra.mxu0 %v54_v25  ;;  %331 = vmatprep.subr.mxu1 %v119_v26  ;;  %v111_v42 = vld [vmem:[%s3468_s1 + $0x258] sm:$0xff]  ;;  %v45_v43 = vld [vmem:[%s3468_s1 + $0x48] sm:$0xff]  ;;  %v110_v44 = vld [vmem:[%s3468_s1 + $0x250] sm:$0xff] }
  0x10   :  { %262 = vmatprep.subr.mxu0 %v53_v27  ;;  %332 = vmatpush1.msra.mxu1 %v118_v28  ;;  %v44_v45 = vld [vmem:[%s3468_s1 + $0x40] sm:$0xff]  ;;  %v109_v46 = vld [vmem:[%s3468_s1 + $0x248] sm:$0xff]  ;;  %v43_v47 = vld [vmem:[%s3468_s1 + $0x38] sm:$0xff] }
  0x11   :  { %263 = vmatpush1.msra.mxu0 %v52_v29  ;;  %333 = vmatprep.subr.mxu1 %v117_v30  ;;  %v108_v48 = vld [vmem:[%s3468_s1 + $0x240] sm:$0xff]  ;;  %v42_v49 = vld [vmem:[%s3468_s1 + $0x30] sm:$0xff]  ;;  %v107_v50 = vld [vmem:[%s3468_s1 + $0x238] sm:$0xff] }
  0x12   :  { %264 = vmatprep.subr.mxu0 %v51_v31  ;;  %334 = vmatpush1.msra.mxu1 %v116_v32  ;;  %v41_v51 = vld [vmem:[%s3468_s1 + $0x28] sm:$0xff]  ;;  %v106_v52 = vld [vmem:[%s3468_s1 + $0x230] sm:$0xff]  ;;  %v40_v53 = vld [vmem:[%s3468_s1 + $0x20] sm:$0xff] }
  0x13   :  { %265 = vmatpush1.msra.mxu0 %v50_v33  ;;  %335 = vmatprep.subr.mxu1 %v115_v34  ;;  %v105_v54 = vld [vmem:[%s3468_s1 + $0x228] sm:$0xff]  ;;  %v39_v55 = vld [vmem:[%s3468_s1 + $0x18] sm:$0xff]  ;;  %v104_v56 = vld [vmem:[%s3468_s1 + $0x220] sm:$0xff] }
  0x14   :  { %266 = vmatprep.subr.mxu0 %v49_v35  ;;  %336 = vmatpush1.msra.mxu1 %v114_v36  ;;  %v38_v57 = vld [vmem:[%s3468_s1 + $0x10] sm:$0xff]  ;;  %v103_v58 = vld [vmem:[%s3468_s1 + $0x218] sm:$0xff]  ;;  %v37_v59 = vld [vmem:[%s3468_s1 + $0x8] sm:$0xff] }
  0x15   :  { %267 = vmatpush1.msra.mxu0 %v48_v37  ;;  %337 = vmatprep.subr.mxu1 %v113_v38  ;;  %v102_v60 = vld [vmem:[%s3468_s1 + $0x210] sm:$0xff]  ;;  %v36_v61 = vld [vmem:[%s3468_s1] sm:$0xff]  ;;  %v101_v62 = vld [vmem:[%s3468_s1 + $0x208] sm:$0xff] }
  0x16   :  { %268 = vmatprep.subr.mxu0 %v47_v39  ;;  %338 = vmatpush1.msra.mxu1 %v112_v40  ;;  %v99_v63 = vld [vmem:[%s3468_s1 + $0x1f8] sm:$0xff]  ;;  %v100_v0 = vld [vmem:[%s3468_s1 + $0x200] sm:$0xff]  ;;  %v98_v1 = vld [vmem:[%s3468_s1 + $0x1f0] sm:$0xff] }
  0x17   :  { %269 = vmatpush1.msra.mxu0 %v46_v41  ;;  %339 = vmatprep.subr.mxu1 %v111_v42  ;;  %v163_v2 = vld [vmem:[%s3468_s1 + $0x3f8] sm:$0xff]  ;;  %v97_v3 = vld [vmem:[%s3468_s1 + $0x1e8] sm:$0xff]  ;;  %v162_v4 = vld [vmem:[%s3468_s1 + $0x3f0] sm:$0xff] }
  0x18   :  { %270 = vmatprep.subr.mxu0 %v45_v43  ;;  %340 = vmatpush1.msra.mxu1 %v110_v44  ;;  %v96_v5 = vld [vmem:[%s3468_s1 + $0x1e0] sm:$0xff]  ;;  %v161_v6 = vld [vmem:[%s3468_s1 + $0x3e8] sm:$0xff]  ;;  %v95_v7 = vld [vmem:[%s3468_s1 + $0x1d8] sm:$0xff] }
  0x19   :  { %271 = vmatpush1.msra.mxu0 %v44_v45  ;;  %341 = vmatprep.subr.mxu1 %v109_v46  ;;  %v160_v8 = vld [vmem:[%s3468_s1 + $0x3e0] sm:$0xff]  ;;  %v94_v9 = vld [vmem:[%s3468_s1 + $0x1d0] sm:$0xff]  ;;  %v159_v10 = vld [vmem:[%s3468_s1 + $0x3d8] sm:$0xff] }
  0x1a   :  { %272 = vmatprep.subr.mxu0 %v43_v47  ;;  %342 = vmatpush1.msra.mxu1 %v108_v48  ;;  %v93_v11 = vld [vmem:[%s3468_s1 + $0x1c8] sm:$0xff]  ;;  %v158_v12 = vld [vmem:[%s3468_s1 + $0x3d0] sm:$0xff]  ;;  %v92_v13 = vld [vmem:[%s3468_s1 + $0x1c0] sm:$0xff] }
  0x1b   :  { %273 = vmatpush1.msra.mxu0 %v42_v49  ;;  %343 = vmatprep.subr.mxu1 %v107_v50  ;;  %v157_v14 = vld [vmem:[%s3468_s1 + $0x3c8] sm:$0xff]  ;;  %v91_v15 = vld [vmem:[%s3468_s1 + $0x1b8] sm:$0xff]  ;;  %v156_v16 = vld [vmem:[%s3468_s1 + $0x3c0] sm:$0xff] }
  0x1c   :  { %274 = vmatprep.subr.mxu0 %v41_v51  ;;  %344 = vmatpush1.msra.mxu1 %v106_v52  ;;  %v90_v17 = vld [vmem:[%s3468_s1 + $0x1b0] sm:$0xff]  ;;  %v155_v18 = vld [vmem:[%s3468_s1 + $0x3b8] sm:$0xff]  ;;  %v89_v19 = vld [vmem:[%s3468_s1 + $0x1a8] sm:$0xff] }
  0x1d   :  { %275 = vmatpush1.msra.mxu0 %v40_v53  ;;  %345 = vmatprep.subr.mxu1 %v105_v54  ;;  %v154_v20 = vld [vmem:[%s3468_s1 + $0x3b0] sm:$0xff]  ;;  %v88_v21 = vld [vmem:[%s3468_s1 + $0x1a0] sm:$0xff]  ;;  %v153_v22 = vld [vmem:[%s3468_s1 + $0x3a8] sm:$0xff] }
  0x1e   :  { %276 = vmatprep.subr.mxu0 %v39_v55  ;;  %346 = vmatpush1.msra.mxu1 %v104_v56  ;;  %v87_v23 = vld [vmem:[%s3468_s1 + $0x198] sm:$0xff]  ;;  %v152_v24 = vld [vmem:[%s3468_s1 + $0x3a0] sm:$0xff]  ;;  %v86_v25 = vld [vmem:[%s3468_s1 + $0x190] sm:$0xff] }
  0x1f   :  { %277 = vmatpush1.msra.mxu0 %v38_v57  ;;  %347 = vmatprep.subr.mxu1 %v103_v58  ;;  %v151_v26 = vld [vmem:[%s3468_s1 + $0x398] sm:$0xff]  ;;  %v85_v27 = vld [vmem:[%s3468_s1 + $0x188] sm:$0xff]  ;;  %v150_v28 = vld [vmem:[%s3468_s1 + $0x390] sm:$0xff] }
  0x20   :  { %278 = vmatprep.subr.mxu0 %v37_v59  ;;  %348 = vmatpush1.msra.mxu1 %v102_v60  ;;  %v84_v29 = vld [vmem:[%s3468_s1 + $0x180] sm:$0xff]  ;;  %v149_v30 = vld [vmem:[%s3468_s1 + $0x388] sm:$0xff]  ;;  %v83_v31 = vld [vmem:[%s3468_s1 + $0x178] sm:$0xff] }
  0x21   :  { %279 = vmatpush1.msra.mxu0 %v36_v61  ;;  %349 = vmatprep.subr.mxu1 %v101_v62  ;;  %v148_v32 = vld [vmem:[%s3468_s1 + $0x380] sm:$0xff]  ;;  %v82_v33 = vld [vmem:[%s3468_s1 + $0x170] sm:$0xff]  ;;  %v147_v34 = vld [vmem:[%s3468_s1 + $0x378] sm:$0xff] }
  0x22   :  { %280 = vmatprep.subr.mxu0 %v99_v63  ;;  %350 = vmatpush1.msra.mxu1 %v100_v0  ;;  %v81_v35 = vld [vmem:[%s3468_s1 + $0x168] sm:$0xff]  ;;  %v146_v36 = vld [vmem:[%s3468_s1 + $0x370] sm:$0xff]  ;;  %v80_v37 = vld [vmem:[%s3468_s1 + $0x160] sm:$0xff] }
  0x23   :  { %281 = vmatpush2.msra.mxu0 %v98_v1  ;;  %351 = vmatprep.subr.mxu1 %v163_v2  ;;  %v145_v38 = vld [vmem:[%s3468_s1 + $0x368] sm:$0xff]  ;;  %v79_v39 = vld [vmem:[%s3468_s1 + $0x158] sm:$0xff]  ;;  %v144_v40 = vld [vmem:[%s3468_s1 + $0x360] sm:$0xff] }
  0x24   :  { %282 = vmatprep.subr.mxu0 %v97_v3  ;;  %352 = vmatpush2.msra.mxu1 %v162_v4  ;;  %v78_v41 = vld [vmem:[%s3468_s1 + $0x150] sm:$0xff]  ;;  %v143_v42 = vld [vmem:[%s3468_s1 + $0x358] sm:$0xff]  ;;  %v77_v43 = vld [vmem:[%s3468_s1 + $0x148] sm:$0xff] }
  0x25   :  { %283 = vmatpush2.msra.mxu0 %v96_v5  ;;  %353 = vmatprep.subr.mxu1 %v161_v6  ;;  %v142_v44 = vld [vmem:[%s3468_s1 + $0x350] sm:$0xff]  ;;  %v76_v45 = vld [vmem:[%s3468_s1 + $0x140] sm:$0xff]  ;;  %v141_v46 = vld [vmem:[%s3468_s1 + $0x348] sm:$0xff] }
  0x26   :  { %284 = vmatprep.subr.mxu0 %v95_v7  ;;  %354 = vmatpush2.msra.mxu1 %v160_v8  ;;  %v75_v47 = vld [vmem:[%s3468_s1 + $0x138] sm:$0xff]  ;;  %v140_v48 = vld [vmem:[%s3468_s1 + $0x340] sm:$0xff]  ;;  %v74_v49 = vld [vmem:[%s3468_s1 + $0x130] sm:$0xff] }
  0x27   :  { %285 = vmatpush2.msra.mxu0 %v94_v9  ;;  %355 = vmatprep.subr.mxu1 %v159_v10  ;;  %v139_v50 = vld [vmem:[%s3468_s1 + $0x338] sm:$0xff]  ;;  %v73_v51 = vld [vmem:[%s3468_s1 + $0x128] sm:$0xff]  ;;  %v138_v52 = vld [vmem:[%s3468_s1 + $0x330] sm:$0xff] }
  0x28   :  { %286 = vmatprep.subr.mxu0 %v93_v11  ;;  %356 = vmatpush2.msra.mxu1 %v158_v12  ;;  %v72_v53 = vld [vmem:[%s3468_s1 + $0x120] sm:$0xff]  ;;  %v137_v54 = vld [vmem:[%s3468_s1 + $0x328] sm:$0xff]  ;;  %v71_v55 = vld [vmem:[%s3468_s1 + $0x118] sm:$0xff] }
  0x29   :  { %287 = vmatpush2.msra.mxu0 %v92_v13  ;;  %357 = vmatprep.subr.mxu1 %v157_v14  ;;  %v136_v56 = vld [vmem:[%s3468_s1 + $0x320] sm:$0xff]  ;;  %v70_v57 = vld [vmem:[%s3468_s1 + $0x110] sm:$0xff]  ;;  %v135_v58 = vld [vmem:[%s3468_s1 + $0x318] sm:$0xff] }
  0x2a   :  { %288 = vmatprep.subr.mxu0 %v91_v15  ;;  %358 = vmatpush2.msra.mxu1 %v156_v16  ;;  %v69_v59 = vld [vmem:[%s3468_s1 + $0x108] sm:$0xff]  ;;  %v68_v61 = vld [vmem:[%s3468_s1 + $0x100] sm:$0xff]  ;;  %v134_v62 = vld [vmem:[%s3468_s1 + $0x310] sm:$0xff] }
  0x2b   :  { %289 = vmatpush2.msra.mxu0 %v90_v17  ;;  %359 = vmatprep.subr.mxu1 %v155_v18  ;;  %v30_v60 = vld [vmem:[%s3469_s0 + $0x8] sm:$0xff]  ;;  %v29_v63 = vld [vmem:[%s3469_s0] sm:$0xff]  ;;  %v195_v1 = vld [vmem:[%s3468_s1 + $0x4f8] sm:$0xff] }
  0x2c   :  { %290 = vmatprep.subr.mxu0 %v89_v19  ;;  %360 = vmatpush2.msra.mxu1 %v154_v20  ;;  %v133_v0 = vld [vmem:[%s3468_s1 + $0x308] sm:$0xff]  ;;  %v132_v2 = vld [vmem:[%s3468_s1 + $0x300] sm:$0xff]  ;;  %v32_v3 = vld [vmem:[%s3469_s0 + $0x18] sm:$0xff] }
  0x2d   :  { %291 = vmatpush2.msra.mxu0 %v88_v21  ;;  %361 = vmatprep.subr.mxu1 %v153_v22  ;;  %v194_v4 = vld [vmem:[%s3468_s1 + $0x4f0] sm:$0xff]  ;;  %v193_v6 = vld [vmem:[%s3468_s1 + $0x4e8] sm:$0xff]  ;;  %v192_v7 = vld [vmem:[%s3468_s1 + $0x4e0] sm:$0xff]  ;;  %v1747_v22 = vmov 0.0  }
  0x2e   :  { %292 = vmatprep.subr.mxu0 %v87_v23  ;;  %362 = vmatpush2.msra.mxu1 %v152_v24  ;;  %v31_v5 = vld [vmem:[%s3469_s0 + $0x10] sm:$0xff]  ;;  %v231_v8 = vld [vmem:[%s3468_s1 + $0x618] sm:$0xff]  ;;  %v229_v12 = vld [vmem:[%s3468_s1 + $0x608] sm:$0xff] }
  0x2f   :  { %293 = vmatpush2.msra.mxu0 %v86_v25  ;;  %363 = vmatprep.subr.mxu1 %v151_v26  ;;  %v191_v9 = vld [vmem:[%s3468_s1 + $0x4d8] sm:$0xff]  ;;  %v230_v10 = vld [vmem:[%s3468_s1 + $0x610] sm:$0xff]  ;;  %v189_v13 = vld [vmem:[%s3468_s1 + $0x4c8] sm:$0xff] }
  0x30   :  { %294 = vmatprep.subr.mxu0 %v85_v27  ;;  %364 = vmatpush2.msra.mxu1 %v150_v28  ;;  %v190_v11 = vld [vmem:[%s3468_s1 + $0x4d0] sm:$0xff]  ;;  %v34_v14 = vld [vmem:[%s3469_s0 + $0x28] sm:$0xff]  ;;  %v188_v15 = vld [vmem:[%s3468_s1 + $0x4c0] sm:$0xff] }
  0x31   :  { %295 = vmatpush2.msra.mxu0 %v84_v29  ;;  %365 = vmatprep.subr.mxu1 %v149_v30  ;;  %v228_v16 = vld [vmem:[%s3468_s1 + $0x600] sm:$0xff]  ;;  %v187_v17 = vld [vmem:[%s3468_s1 + $0x4b8] sm:$0xff]  ;;  %v186_v18 = vld [vmem:[%s3468_s1 + $0x4b0] sm:$0xff] }
  0x32   :  { %296 = vmatprep.subr.mxu0 %v83_v31  ;;  %366 = vmatpush2.msra.mxu1 %v148_v32  ;;  %v35_v19 = vld [vmem:[%s3469_s0 + $0x30] sm:$0xff]  ;;  %v185_v20 = vld [vmem:[%s3468_s1 + $0x4a8] sm:$0xff]  ;;  %v184_v21 = vld [vmem:[%s3468_s1 + $0x4a0] sm:$0xff] }
  0x33   :  { %297 = vmatpush2.msra.mxu0 %v82_v33  ;;  %367 = vmatprep.subr.mxu1 %v147_v34  ;;  %v183_v23 = vld [vmem:[%s3468_s1 + $0x498] sm:$0xff]  ;;  %v182_v24 = vld [vmem:[%s3468_s1 + $0x490] sm:$0xff]  ;;  %v181_v25 = vld [vmem:[%s3468_s1 + $0x488] sm:$0xff] }
  0x34   :  { %298 = vmatprep.subr.mxu0 %v81_v35  ;;  %368 = vmatpush2.msra.mxu1 %v146_v36  ;;  %v180_v26 = vld [vmem:[%s3468_s1 + $0x480] sm:$0xff]  ;;  %v179_v27 = vld [vmem:[%s3468_s1 + $0x478] sm:$0xff]  ;;  %v178_v28 = vld [vmem:[%s3468_s1 + $0x470] sm:$0xff] }
  0x35   :  { %299 = vmatpush2.msra.mxu0 %v80_v37  ;;  %369 = vmatprep.subr.mxu1 %v145_v38  ;;  %v177_v29 = vld [vmem:[%s3468_s1 + $0x468] sm:$0xff]  ;;  %v176_v30 = vld [vmem:[%s3468_s1 + $0x460] sm:$0xff]  ;;  %v175_v31 = vld [vmem:[%s3468_s1 + $0x458] sm:$0xff] }
  0x36   :  { %300 = vmatprep.subr.mxu0 %v79_v39  ;;  %370 = vmatpush2.msra.mxu1 %v144_v40  ;;  %v174_v32 = vld [vmem:[%s3468_s1 + $0x450] sm:$0xff]  ;;  %v173_v33 = vld [vmem:[%s3468_s1 + $0x448] sm:$0xff]  ;;  %v172_v34 = vld [vmem:[%s3468_s1 + $0x440] sm:$0xff] }
  0x37   :  { %301 = vmatpush2.msra.mxu0 %v78_v41  ;;  %371 = vmatprep.subr.mxu1 %v143_v42  ;;  %v171_v35 = vld [vmem:[%s3468_s1 + $0x438] sm:$0xff]  ;;  %v170_v36 = vld [vmem:[%s3468_s1 + $0x430] sm:$0xff]  ;;  %v169_v37 = vld [vmem:[%s3468_s1 + $0x428] sm:$0xff] }
  0x38   :  { %302 = vmatprep.subr.mxu0 %v77_v43  ;;  %372 = vmatpush2.msra.mxu1 %v142_v44  ;;  %v168_v38 = vld [vmem:[%s3468_s1 + $0x420] sm:$0xff]  ;;  %v167_v39 = vld [vmem:[%s3468_s1 + $0x418] sm:$0xff]  ;;  %v166_v40 = vld [vmem:[%s3468_s1 + $0x410] sm:$0xff] }
  0x39   :  { %303 = vmatpush2.msra.mxu0 %v76_v45  ;;  %373 = vmatprep.subr.mxu1 %v141_v46  ;;  %v165_v41 = vld [vmem:[%s3468_s1 + $0x408] sm:$0xff]  ;;  %v164_v42 = vld [vmem:[%s3468_s1 + $0x400] sm:$0xff]  ;;  %v227_v43 = vld [vmem:[%s3468_s1 + $0x5f8] sm:$0xff] }
  0x3a   :  { %304 = vmatprep.subr.mxu0 %v75_v47  ;;  %374 = vmatpush2.msra.mxu1 %v140_v48  ;;  %v226_v44 = vld [vmem:[%s3468_s1 + $0x5f0] sm:$0xff]  ;;  %v225_v45 = vld [vmem:[%s3468_s1 + $0x5e8] sm:$0xff]  ;;  %v224_v46 = vld [vmem:[%s3468_s1 + $0x5e0] sm:$0xff] }
  0x3b   :  { %305 = vmatpush2.msra.mxu0 %v74_v49  ;;  %375 = vmatprep.subr.mxu1 %v139_v50  ;;  %v223_v47 = vld [vmem:[%s3468_s1 + $0x5d8] sm:$0xff]  ;;  %v222_v48 = vld [vmem:[%s3468_s1 + $0x5d0] sm:$0xff]  ;;  %v221_v49 = vld [vmem:[%s3468_s1 + $0x5c8] sm:$0xff] }
  0x3c   :  { %306 = vmatprep.subr.mxu0 %v73_v51  ;;  %376 = vmatpush2.msra.mxu1 %v138_v52  ;;  %v220_v50 = vld [vmem:[%s3468_s1 + $0x5c0] sm:$0xff]  ;;  %v219_v51 = vld [vmem:[%s3468_s1 + $0x5b8] sm:$0xff]  ;;  %v218_v52 = vld [vmem:[%s3468_s1 + $0x5b0] sm:$0xff] }
  0x3d   :  { %307 = vmatpush2.msra.mxu0 %v72_v53  ;;  %377 = vmatprep.subr.mxu1 %v137_v54  ;;  %v217_v53 = vld [vmem:[%s3468_s1 + $0x5a8] sm:$0xff]  ;;  %v216_v54 = vld [vmem:[%s3468_s1 + $0x5a0] sm:$0xff] }
  0x3e   :  { %308 = vmatprep.subr.mxu0 %v71_v55  ;;  %378 = vmatpush2.msra.mxu1 %v136_v56  ;;  %v215_v55 = vld [vmem:[%s3468_s1 + $0x598] sm:$0xff]  ;;  %v214_v56 = vld [vmem:[%s3468_s1 + $0x590] sm:$0xff] }
  0x3f   :  { %309 = vmatpush2.msra.mxu0 %v70_v57  ;;  %379 = vmatprep.subr.mxu1 %v135_v58  ;;  %v213_v57 = vld [vmem:[%s3468_s1 + $0x588] sm:$0xff]  ;;  %v212_v58 = vld [vmem:[%s3468_s1 + $0x580] sm:$0xff] }
  0x40   :  { %310 = vmatprep.subr.mxu0 %v69_v59  ;;  %312 = vmatprep.mubr.f32.mxu0 %v30_v60  ;;  %v211_v59 = vld [vmem:[%s3468_s1 + $0x578] sm:$0xff]  ;;  %v210_v60 = vld [vmem:[%s3468_s1 + $0x570] sm:$0xff] }
  0x41   :  { %311 = vmatpush2.msra.mxu0 %v68_v61  ;;  %380 = vmatpush2.msra.mxu1 %v134_v62  ;;  %v209_v61 = vld [vmem:[%s3468_s1 + $0x568] sm:$0xff]  ;;  %v208_v62 = vld [vmem:[%s3468_s1 + $0x560] sm:$0xff] }
  0x42   :  { %313 = vmatmul.mubr.f32.vlgmr.msra.gmra.mxu0 %v29_v63  ;;  %381 = vmatprep.subr.mxu1 %v133_v0  ;;  %v207_v63 = vld [vmem:[%s3468_s1 + $0x558] sm:$0xff]  ;;  %v206_v0 = vld [vmem:[%s3468_s1 + $0x550] sm:$0xff] }
  0x43   :  { %390 = vmatprep.subr.mxu0 %v195_v1  ;;  %382 = vmatpush2.msra.mxu1 %v132_v2  ;;  %v205_v1 = vld [vmem:[%s3468_s1 + $0x548] sm:$0xff]  ;;  %v204_v2 = vld [vmem:[%s3468_s1 + $0x540] sm:$0xff] }
  0x44   :  { %383 = vmatprep.mubr.f32.mxu1 %v32_v3  ;;  %391 = vmatpush1.msra.mxu0 %v194_v4  ;;  %v203_v3 = vld [vmem:[%s3468_s1 + $0x538] sm:$0xff]  ;;  %v202_v4 = vld [vmem:[%s3468_s1 + $0x530] sm:$0xff] }
  0x45   :  { %384 = vmatmul.mubr.f32.vlgmr.msra.gmra.mxu1 %v31_v5  ;;  %392 = vmatprep.subr.mxu0 %v193_v6  ;;  %v201_v5 = vld [vmem:[%s3468_s1 + $0x528] sm:$0xff]  ;;  %v200_v6 = vld [vmem:[%s3468_s1 + $0x520] sm:$0xff] }
  0x46   :  { %393 = vmatpush1.msra.mxu0 %v192_v7  ;;  %489 = vmatprep.subr.mxu1 %v231_v8  ;;  %v199_v7 = vld [vmem:[%s3468_s1 + $0x518] sm:$0xff]  ;;  %v198_v8 = vld [vmem:[%s3468_s1 + $0x510] sm:$0xff] }
  0x47   :  { %394 = vmatprep.subr.mxu0 %v191_v9  ;;  %490 = vmatpush1.msra.mxu1 %v230_v10  ;;  %v197_v9 = vld [vmem:[%s3468_s1 + $0x508] sm:$0xff]  ;;  %v196_v10 = vld [vmem:[%s3468_s1 + $0x500] sm:$0xff] }
  0x48   :  { %395 = vmatpush1.msra.mxu0 %v190_v11  ;;  %491 = vmatprep.subr.mxu1 %v229_v12  ;;  %v33_v11 = vld [vmem:[%s3469_s0 + $0x20] sm:$0xff]  ;;  %v565_v12 = vld [vmem:[%s3470_s2 + $0xf8] sm:$0xff] }
  0x49   :  { %396 = vmatprep.subr.mxu0 %v189_v13  ;;  %454 = vmatprep.mubr.f32.mxu0 %v34_v14  ;;  %v549_v13 = vld [vmem:[%s3470_s2 + $0x78] sm:$0xff]  ;;  %v564_v14 = vld [vmem:[%s3470_s2 + $0xf0] sm:$0xff] }
  0x4a   :  { %397 = vmatpush1.msra.mxu0 %v188_v15  ;;  %492 = vmatpush1.msra.mxu1 %v228_v16  ;;  %v548_v15 = vld [vmem:[%s3470_s2 + $0x70] sm:$0xff]  ;;  %v563_v16 = vld [vmem:[%s3470_s2 + $0xe8] sm:$0xff] }
  0x4b   :  { %398 = vmatprep.subr.mxu0 %v187_v17  ;;  %525 = vmatprep.mubr.f32.mxu1 %v1747_v22  ;;  %v547_v17 = vld [vmem:[%s3470_s2 + $0x68] sm:$0xff] }
  0x4c   :  { %399 = vmatpush1.msra.mxu0 %v186_v18  ;;  %1532 = vmatmul.mubr.msk.f32.vlgmr.msra.gmra.mxu1 %vm244_vm0, %v35_v19  ;;  %v562_v18 = vld [vmem:[%s3470_s2 + $0xe0] sm:$0xff] }
  0x4d   :  { %400 = vmatprep.subr.mxu0 %v185_v20  ;;  %1543 = vmatprep.subr.mxu1 %v565_v12  ;;  %v546_v19 = vld [vmem:[%s3470_s2 + $0x60] sm:$0xff]  ;;  %v561_v20 = vld [vmem:[%s3470_s2 + $0xd8] sm:$0xff]  ;;  %v647_v12 = vld [vmem:[%s3472_s3 + $0x48] sm:$0xff] }
  0x4e   :  { %401 = vmatpush1.msra.mxu0 %v184_v21  ;;  %1544 = vmatpush3.msra.mxu1 %v549_v13  ;;  %v545_v21 = vld [vmem:[%s3470_s2 + $0x58] sm:$0xff]  ;;  %v646_v13 = vld [vmem:[%s3472_s3 + $0x40] sm:$0xff] }
  0x4f   :  { %402 = vmatprep.subr.mxu0 %v183_v23  ;;  %1545 = vmatprep.subr.mxu1 %v564_v14  ;;  %v560_v23 = vld [vmem:[%s3470_s2 + $0xd0] sm:$0xff]  ;;  %v645_v14 = vld [vmem:[%s3472_s3 + $0x38] sm:$0xff] }
  0x50   :  { %403 = vmatpush1.msra.mxu0 %v182_v24  ;;  %1546 = vmatpush3.msra.mxu1 %v548_v15  ;;  %v544_v24 = vld [vmem:[%s3470_s2 + $0x50] sm:$0xff] }
  0x51   :  { %404 = vmatprep.subr.mxu0 %v181_v25  ;;  %1547 = vmatprep.subr.mxu1 %v563_v16  ;;  %v559_v25 = vld [vmem:[%s3470_s2 + $0xc8] sm:$0xff]  ;;  %v644_v15 = vld [vmem:[%s3472_s3 + $0x30] sm:$0xff] }
  0x52   :  { %405 = vmatpush1.msra.mxu0 %v180_v26  ;;  %1548 = vmatpush3.msra.mxu1 %v547_v17  ;;  %v543_v26 = vld [vmem:[%s3470_s2 + $0x48] sm:$0xff]  ;;  %v642_v17 = vld [vmem:[%s3472_s3 + $0x20] sm:$0xff] }
  0x53   :  { %406 = vmatprep.subr.mxu0 %v179_v27  ;;  %1549 = vmatprep.subr.mxu1 %v562_v18  ;;  %v558_v27 = vld [vmem:[%s3470_s2 + $0xc0] sm:$0xff]  ;;  %v643_v16 = vld [vmem:[%s3472_s3 + $0x28] sm:$0xff]  ;;  %v641_v18 = vld [vmem:[%s3472_s3 + $0x18] sm:$0xff] }
  0x54   :  { %407 = vmatpush1.msra.mxu0 %v178_v28  ;;  %1550 = vmatpush3.msra.mxu1 %v546_v19  ;;  %v542_v28 = vld [vmem:[%s3470_s2 + $0x40] sm:$0xff]  ;;  %v640_v19 = vld [vmem:[%s3472_s3 + $0x10] sm:$0xff] }
  0x55   :  { %408 = vmatprep.subr.mxu0 %v177_v29  ;;  %1551 = vmatprep.subr.mxu1 %v561_v20  ;;  %v557_v29 = vld [vmem:[%s3470_s2 + $0xb8] sm:$0xff]  ;;  %v639_v20 = vld [vmem:[%s3472_s3 + $0x8] sm:$0xff] }
  0x56   :  { %409 = vmatpush1.msra.mxu0 %v176_v30  ;;  %1552 = vmatpush3.msra.mxu1 %v545_v21  ;;  %v541_v30 = vld [vmem:[%s3470_s2 + $0x38] sm:$0xff]  ;;  %v638_v21 = vld [vmem:[%s3472_s3] sm:$0xff] }
  0x57   :  { %410 = vmatprep.subr.mxu0 %v175_v31  ;;  %1553 = vmatprep.subr.mxu1 %v560_v23  ;;  %v556_v31 = vld [vmem:[%s3470_s2 + $0xb0] sm:$0xff]  ;;  %v741_v23 = vld [vmem:[%s3473_s4 + $0x78] sm:$0xff] }
  0x58   :  { %411 = vmatpush1.msra.mxu0 %v174_v32  ;;  %1554 = vmatpush3.msra.mxu1 %v544_v24  ;;  %v540_v32 = vld [vmem:[%s3470_s2 + $0x30] sm:$0xff] }
  0x59   :  { %412 = vmatprep.subr.mxu0 %v173_v33  ;;  %1555 = vmatprep.subr.mxu1 %v559_v25  ;;  %v555_v33 = vld [vmem:[%s3470_s2 + $0xa8] sm:$0xff]  ;;  %v740_v24 = vld [vmem:[%s3473_s4 + $0x70] sm:$0xff] }
  0x5a   :  { %413 = vmatpush1.msra.mxu0 %v172_v34  ;;  %1556 = vmatpush3.msra.mxu1 %v543_v26  ;;  %v539_v34 = vld [vmem:[%s3470_s2 + $0x28] sm:$0xff]  ;;  %v738_v26 = vld [vmem:[%s3473_s4 + $0x60] sm:$0xff] }
  0x5b   :  { %414 = vmatprep.subr.mxu0 %v171_v35  ;;  %1557 = vmatprep.subr.mxu1 %v558_v27  ;;  %v554_v35 = vld [vmem:[%s3470_s2 + $0xa0] sm:$0xff]  ;;  %v739_v25 = vld [vmem:[%s3473_s4 + $0x68] sm:$0xff]  ;;  %v737_v27 = vld [vmem:[%s3473_s4 + $0x58] sm:$0xff] }
  0x5c   :  { %415 = vmatpush1.msra.mxu0 %v170_v36  ;;  %1558 = vmatpush3.msra.mxu1 %v542_v28  ;;  %v538_v36 = vld [vmem:[%s3470_s2 + $0x20] sm:$0xff]  ;;  %v736_v28 = vld [vmem:[%s3473_s4 + $0x50] sm:$0xff] }
  0x5d   :  { %416 = vmatprep.subr.mxu0 %v169_v37  ;;  %1559 = vmatprep.subr.mxu1 %v557_v29  ;;  %v553_v37 = vld [vmem:[%s3470_s2 + $0x98] sm:$0xff]  ;;  %v735_v29 = vld [vmem:[%s3473_s4 + $0x48] sm:$0xff] }
  0x5e   :  { %417 = vmatpush1.msra.mxu0 %v168_v38  ;;  %1560 = vmatpush3.msra.mxu1 %v541_v30  ;;  %v537_v38 = vld [vmem:[%s3470_s2 + $0x18] sm:$0xff]  ;;  %v734_v30 = vld [vmem:[%s3473_s4 + $0x40] sm:$0xff] }
  0x5f   :  { %418 = vmatprep.subr.mxu0 %v167_v39  ;;  %1561 = vmatprep.subr.mxu1 %v556_v31  ;;  %v552_v39 = vld [vmem:[%s3470_s2 + $0x90] sm:$0xff]  ;;  %v733_v31 = vld [vmem:[%s3473_s4 + $0x38] sm:$0xff] }
  0x60   :  { %419 = vmatpush1.msra.mxu0 %v166_v40  ;;  %1562 = vmatpush3.msra.mxu1 %v540_v32  ;;  %v536_v40 = vld [vmem:[%s3470_s2 + $0x10] sm:$0xff] }
  0x61   :  { %420 = vmatprep.subr.mxu0 %v165_v41  ;;  %1563 = vmatprep.subr.mxu1 %v555_v33  ;;  %v551_v41 = vld [vmem:[%s3470_s2 + $0x88] sm:$0xff]  ;;  %v732_v32 = vld [vmem:[%s3473_s4 + $0x30] sm:$0xff] }
  0x62   :  { %421 = vmatpush1.msra.mxu0 %v164_v42  ;;  %1564 = vmatpush3.msra.mxu1 %v539_v34  ;;  %v535_v42 = vld [vmem:[%s3470_s2 + $0x8] sm:$0xff]  ;;  %v730_v34 = vld [vmem:[%s3473_s4 + $0x20] sm:$0xff] }
  0x63   :  { %422 = vmatprep.subr.mxu0 %v227_v43  ;;  %1565 = vmatprep.subr.mxu1 %v554_v35  ;;  %v550_v43 = vld [vmem:[%s3470_s2 + $0x80] sm:$0xff]  ;;  %v731_v33 = vld [vmem:[%s3473_s4 + $0x28] sm:$0xff]  ;;  %v729_v35 = vld [vmem:[%s3473_s4 + $0x18] sm:$0xff] }
  0x64   :  { %423 = vmatpush2.msra.mxu0 %v226_v44  ;;  %1566 = vmatpush3.msra.mxu1 %v538_v36  ;;  %v534_v44 = vld [vmem:[%s3470_s2] sm:$0xff] }
  0x65   :  { %424 = vmatprep.subr.mxu0 %v225_v45  ;;  %1567 = vmatprep.subr.mxu1 %v553_v37  ;;  %v234_v45 = vlaneseq  ;;  %v566_v37 = vld [vmem:[%s3471_s7 + $0x1] ss:$0 sm:$0xff] }
  0x66   :  { %425 = vmatpush2.msra.mxu0 %v224_v46  ;;  %1568 = vmatpush3.msra.mxu1 %v537_v38 }
  0x67   :  { %426 = vmatprep.subr.mxu0 %v223_v47  ;;  %1569 = vmatprep.subr.mxu1 %v552_v39  ;;  %v2503_v46 = vshrl.u32 %v234_v45, 7  ;;  %v845_v45 = vld [vmem:[%s3474_s5 + $0xf8] sm:$0xff] }
  0x68   :  { %427 = vmatpush2.msra.mxu0 %v222_v48  ;;  %1570 = vmatpush3.msra.mxu1 %v536_v40  ;;  %v232_v48 = vld [vmem:[%s3471_s7] ss:$8 sm:$0x3] }
  0x69   :  { %428 = vmatprep.subr.mxu0 %v221_v49  ;;  %1571 = vmatprep.subr.mxu1 %v551_v41  ;;  %v2506_v47 = vsub.s32 0, %v2503_v46  ;;  %v2512_v49 = vsub.s32 1, %v2503_v46 }
  0x6a   :  { %429 = vmatpush2.msra.mxu0 %v220_v50  ;;  %1572 = vmatpush3.msra.mxu1 %v535_v42  ;;  %v728_v42 = vld [vmem:[%s3473_s4 + $0x10] sm:$0xff] }
  0x6b   :  { %430 = vmatprep.subr.mxu0 %v219_v51  ;;  %1573 = vmatprep.subr.mxu1 %v550_v43  ;;  %v237_v51 = vrot.slane %v232_v48, %v2506_v47  ;;  %v727_v43 = vld [vmem:[%s3473_s4 + $0x8] sm:$0xff] }
  0x6c   :  { %431 = vmatpush2.msra.mxu0 %v218_v52  ;;  %1574 = vmatpush3.msra.mxu1 %v534_v44  ;;  %v241_v52 = vrot.slane %v232_v48, %v2512_v49  ;;  %v726_v44 = vld [vmem:[%s3473_s4] sm:$0xff]  ;;  %v844_v48 = vld [vmem:[%s3474_s5 + $0xf0] sm:$0xff] }
  0x6d   :  { %432 = vmatprep.subr.mxu0 %v217_v53  ;;  %1647 = vmatprep.subr.mxu1 %v1747_v22 }
  0x6e   :  { %433 = vmatpush2.msra.mxu0 %v216_v54 }
  0x6f   :  { %434 = vmatprep.subr.mxu0 %v215_v55 }
  0x70   :  { %435 = vmatpush2.msra.mxu0 %v214_v56 }
  0x71   :  { %436 = vmatprep.subr.mxu0 %v213_v57 }
  0x72   :  { %437 = vmatpush2.msra.mxu0 %v212_v58 }
  0x73   :  { %438 = vmatprep.subr.mxu0 %v211_v59 }
  0x74   :  { %439 = vmatpush2.msra.mxu0 %v210_v60 }
  0x75   :  { %440 = vmatprep.subr.mxu0 %v209_v61 }
  0x76   :  { %441 = vmatpush2.msra.mxu0 %v208_v62 }
  0x77   :  { %442 = vmatprep.subr.mxu0 %v207_v63 }
  0x78   :  { %443 = vmatpush2.msra.mxu0 %v206_v0 }
  0x79   :  { %444 = vmatprep.subr.mxu0 %v205_v1 }
  0x7a   :  { %445 = vmatpush2.msra.mxu0 %v204_v2 }
  0x7b   :  { %446 = vmatprep.subr.mxu0 %v203_v3 }
  0x7c   :  { %447 = vmatpush2.msra.mxu0 %v202_v4 }
  0x7d   :  { %448 = vmatprep.subr.mxu0 %v201_v5 }
  0x7e   :  { %449 = vmatpush2.msra.mxu0 %v200_v6  ;;  %v653_v6 = vld [vmem:[%s3472_s3 + $0x78] sm:$0xff] }
  0x7f   :  { %450 = vmatprep.subr.mxu0 %v199_v7  ;;  %v652_v7 = vld [vmem:[%s3472_s3 + $0x70] sm:$0xff] }
  0x80   :  { %451 = vmatpush2.msra.mxu0 %v198_v8  ;;  %v651_v8 = vld [vmem:[%s3472_s3 + $0x68] sm:$0xff] }
  0x81   :  { %452 = vmatprep.subr.mxu0 %v197_v9  ;;  %v650_v9 = vld [vmem:[%s3472_s3 + $0x60] sm:$0xff] }
  0x82   :  { %453 = vmatpush2.msra.mxu0 %v196_v10  ;;  %v649_v10 = vld [vmem:[%s3472_s3 + $0x58] sm:$0xff] }
  0x83   :  { %455 = vmatmul.mubr.f32.vlgmr.msra.gmra.mxu0 %v33_v11  ;;  %1682 = vmatprep.subr.mxu0 %v1747_v22  ;;  %v648_v11 = vld [vmem:[%s3472_s3 + $0x50] sm:$0xff] }
  0x84   :  { %1714 = vmatprep.mubr.msk.f32.mxu0 %vm1748_vm1, %v1747_v22  ;;  %1683 = vmatpush3.msra.mxu0 %v741_v23  ;;  %v1037_v23 = vld [vmem:[%s3475_s6 + $0x348] sm:$0xff] }
  0x85   :  { %1684 = vmatprep.subr.mxu0 %v1747_v22 }
  0x86   :  { %1685 = vmatpush3.msra.mxu0 %v740_v24  ;;  %v1031_v24 = vld [vmem:[%s3475_s6 + $0x318] sm:$0xff] }
  0x87   :  { %1686 = vmatprep.subr.mxu0 %v1747_v22 }
  0x88   :  { %1687 = vmatpush3.msra.mxu0 %v739_v25  ;;  %v1030_v25 = vld [vmem:[%s3475_s6 + $0x310] sm:$0xff] }
  0x89   :  { %1688 = vmatprep.subr.mxu0 %v1747_v22 }
  0x8a   :  { %1689 = vmatpush3.msra.mxu0 %v738_v26  ;;  %v1024_v26 = vld [vmem:[%s3475_s6 + $0x2e0] sm:$0xff] }
  0x8b   :  { %1690 = vmatprep.subr.mxu0 %v1747_v22 }
  0x8c   :  { %1691 = vmatpush3.msra.mxu0 %v737_v27  ;;  %v1023_v27 = vld [vmem:[%s3475_s6 + $0x2d8] sm:$0xff] }
  0x8d   :  { %1692 = vmatprep.subr.mxu0 %v1747_v22 }
  0x8e   :  { %1693 = vmatpush3.msra.mxu0 %v736_v28  ;;  %v1017_v28 = vld [vmem:[%s3475_s6 + $0x2a8] sm:$0xff] }
  0x8f   :  { %1694 = vmatprep.subr.mxu0 %v1747_v22 }
  0x90   :  { %1695 = vmatpush3.msra.mxu0 %v735_v29  ;;  %v1016_v29 = vld [vmem:[%s3475_s6 + $0x2a0] sm:$0xff] }
  0x91   :  { %1696 = vmatprep.subr.mxu0 %v1747_v22 }
  0x92   :  { %1697 = vmatpush3.msra.mxu0 %v734_v30  ;;  %v1010_v30 = vld [vmem:[%s3475_s6 + $0x270] sm:$0xff] }
  0x93   :  { %1698 = vmatprep.subr.mxu0 %v1747_v22 }
  0x94   :  { %1699 = vmatpush3.msra.mxu0 %v733_v31  ;;  %v1009_v31 = vld [vmem:[%s3475_s6 + $0x268] sm:$0xff] }
  0x95   :  { %1700 = vmatprep.subr.mxu0 %v1747_v22 }
  0x96   :  { %1701 = vmatpush3.msra.mxu0 %v732_v32  ;;  %v1003_v32 = vld [vmem:[%s3475_s6 + $0x238] sm:$0xff] }
  0x97   :  { %1702 = vmatprep.subr.mxu0 %v1747_v22 }
  0x98   :  { %1703 = vmatpush3.msra.mxu0 %v731_v33  ;;  %v1002_v33 = vld [vmem:[%s3475_s6 + $0x230] sm:$0xff] }
  0x99   :  { %1704 = vmatprep.subr.mxu0 %v1747_v22 }
  0x9a   :  { %1705 = vmatpush3.msra.mxu0 %v730_v34  ;;  %v996_v34 = vld [vmem:[%s3475_s6 + $0x200] sm:$0xff] }
  0x9b   :  { %1706 = vmatprep.subr.mxu0 %v1747_v22 }
  0x9c   :  { %1707 = vmatpush3.msra.mxu0 %v729_v35  ;;  %v995_v35 = vld [vmem:[%s3475_s6 + $0x1f8] sm:$0xff] }
  0x9d   :  { %1708 = vmatprep.subr.mxu0 %v1747_v22 }
  0x9e   :  { %1709 = vmatpush3.msra.mxu0 %v728_v42  ;;  %v968_v42 = vld [vmem:[%s3475_s6 + $0x120] sm:$0xff] }
  0x9f   :  { %1710 = vmatprep.subr.mxu0 %v1747_v22 }
  0xa0   :  { %1711 = vmatpush3.msra.mxu0 %v727_v43  ;;  %v967_v43 = vld [vmem:[%s3475_s6 + $0x118] sm:$0xff] }
  0xa1   :  { %1712 = vmatprep.subr.mxu0 %v1747_v22 }
  0xa2   :  { %1713 = vmatpush3.msra.mxu0 %v726_v44  ;;  %v961_v44 = vld [vmem:[%s3475_s6 + $0xe8] sm:$0xff] }
 0x102   :  { %v314_v50 = vpop.f32.mrf.mxu0 }
 0x103   :  { %v315_v55 = vadd.f32 %v314_v50, %v237_v51  ;;  %v843_v50 = vld [vmem:[%s3474_s5 + $0xe8] sm:$0xff]  ;;  %v841_v51 = vld [vmem:[%s3474_s5 + $0xd8] sm:$0xff] }
 0x104   :  { %v316_v53 = vpop.f32.mrf.mxu0 }
 0x105   :  { %v385_v54 = vpop.f32.mrf.mxu1  ;;  %v317_v56 = vadd.f32 %v316_v53, %v241_v52  ;;  %v840_v52 = vld [vmem:[%s3474_s5 + $0xd0] sm:$0xff]  ;;  %v839_v53 = vld [vmem:[%s3474_s5 + $0xc8] sm:$0xff] }
 0x106   :  { %v386_v58 = vadd.f32 %v385_v54, %v315_v55  ;;  %v838_v54 = vld [vmem:[%s3474_s5 + $0xc0] sm:$0xff]  ;;  %v837_v55 = vld [vmem:[%s3474_s5 + $0xb8] sm:$0xff] }
 0x107   :  { %v387_v57 = vpop.f32.mrf.mxu1 }
 0x108   :  { %v388_v61 = vadd.f32 %v387_v57, %v317_v56  ;;  %v836_v56 = vld [vmem:[%s3474_s5 + $0xb0] sm:$0xff]  ;;  %v835_v57 = vld [vmem:[%s3474_s5 + $0xa8] sm:$0xff] }
 0x10c   :  { %v527_v60 = vpop.f32.mrf.mxu1 }
 0x10e   :  { %v529_v2 = vpop.f32.mrf.mxu1 }
 0x143   :  { %v456_v59 = vpop.f32.mrf.mxu0 }
 0x144   :  { %v457_v62 = vadd.f32 %v456_v59, %v386_v58  ;;  %v834_v58 = vld [vmem:[%s3474_s5 + $0xa0] sm:$0xff]  ;;  %v833_v59 = vld [vmem:[%s3474_s5 + $0x98] sm:$0xff] }
 0x145   :  { %v458_v63 = vpop.f32.mrf.mxu0 }
 0x146   :  { %v459_v0 = vadd.f32 %v458_v63, %v388_v61  ;;  %v528_v1 = vadd.f32 %v527_v60, %v457_v62  ;;  %v832_v60 = vld [vmem:[%s3474_s5 + $0x90] sm:$0xff]  ;;  %v831_v61 = vld [vmem:[%s3474_s5 + $0x88] sm:$0xff]  ;;  %v830_v62 = vld [vmem:[%s3474_s5 + $0x80] sm:$0xff] }
 0x147   :  { %v829_v63 = vld [vmem:[%s3474_s5 + $0x78] sm:$0xff] }
 0x148   :  { %v530_v3 = vadd.f32 %v529_v2, %v459_v0  ;;  %v532_v5 = vmax.f32 %v528_v1, 0.0  ;;  %v828_v0 = vld [vmem:[%s3474_s5 + $0x70] sm:$0xff]  ;;  %v827_v1 = vld [vmem:[%s3474_s5 + $0x68] sm:$0xff]  ;;  %v826_v2 = vld [vmem:[%s3474_s5 + $0x60] sm:$0xff] }
 0x14a   :  { %v533_v4 = vmax.f32 %v530_v3, 0.0  ;;  %v825_v3 = vld [vmem:[%s3474_s5 + $0x58] sm:$0xff] }
 0x14c   :  { %631 = vmatprep.mubr.f32.mxu1 %v533_v4  ;;  %v824_v4 = vld [vmem:[%s3474_s5 + $0x50] sm:$0xff] }
 0x14d   :  { %632 = vmatmul.mubr.f32.vlgmr.msra.gmra.mxu1 %v532_v5  ;;  %v823_v5 = vld [vmem:[%s3474_s5 + $0x48] sm:$0xff] }
 0x14e   :  { %1648 = vmatpush3.msra.mxu1 %v653_v6  ;;  %1679 = vmatprep.mubr.msk.f32.mxu1 %vm1748_vm1, %v1747_v22  ;;  %v822_v6 = vld [vmem:[%s3474_s5 + $0x40] sm:$0xff] }
 0x14f   :  { %1649 = vmatprep.subr.mxu1 %v1747_v22 }
 0x150   :  { %1650 = vmatpush3.msra.mxu1 %v652_v7  ;;  %v821_v7 = vld [vmem:[%s3474_s5 + $0x38] sm:$0xff] }
 0x151   :  { %1651 = vmatprep.subr.mxu1 %v1747_v22 }
 0x152   :  { %1652 = vmatpush3.msra.mxu1 %v651_v8  ;;  %v820_v8 = vld [vmem:[%s3474_s5 + $0x30] sm:$0xff] }
 0x153   :  { %1653 = vmatprep.subr.mxu1 %v1747_v22 }
 0x154   :  { %1654 = vmatpush3.msra.mxu1 %v650_v9  ;;  %v819_v9 = vld [vmem:[%s3474_s5 + $0x28] sm:$0xff] }
 0x155   :  { %1655 = vmatprep.subr.mxu1 %v1747_v22 }
 0x156   :  { %1656 = vmatpush3.msra.mxu1 %v649_v10  ;;  %v654_v10 = vld [vmem:[%s3471_s7 + $0x2] ss:$0 sm:$0xff] }
 0x157   :  { %1657 = vmatprep.subr.mxu1 %v1747_v22 }
 0x158   :  { %1658 = vmatpush3.msra.mxu1 %v648_v11 }
 0x159   :  { %1659 = vmatprep.subr.mxu1 %v1747_v22 }
 0x15a   :  { %1660 = vmatpush3.msra.mxu1 %v647_v12 }
 0x15b   :  { %1661 = vmatprep.subr.mxu1 %v1747_v22 }
 0x15c   :  { %1662 = vmatpush3.msra.mxu1 %v646_v13 }
 0x15d   :  { %1663 = vmatprep.subr.mxu1 %v1747_v22 }
 0x15e   :  { %1664 = vmatpush3.msra.mxu1 %v645_v14 }
 0x15f   :  { %1665 = vmatprep.subr.mxu1 %v1747_v22 }
 0x160   :  { %1666 = vmatpush3.msra.mxu1 %v644_v15  ;;  %v818_v15 = vld [vmem:[%s3474_s5 + $0x20] sm:$0xff] }
 0x161   :  { %1667 = vmatprep.subr.mxu1 %v1747_v22 }
 0x162   :  { %1668 = vmatpush3.msra.mxu1 %v643_v16  ;;  %v817_v16 = vld [vmem:[%s3474_s5 + $0x18] sm:$0xff] }
 0x163   :  { %1669 = vmatprep.subr.mxu1 %v1747_v22 }
 0x164   :  { %1670 = vmatpush3.msra.mxu1 %v642_v17  ;;  %v816_v17 = vld [vmem:[%s3474_s5 + $0x10] sm:$0xff] }
 0x165   :  { %1671 = vmatprep.subr.mxu1 %v1747_v22 }
 0x166   :  { %1672 = vmatpush3.msra.mxu1 %v641_v18  ;;  %v815_v18 = vld [vmem:[%s3474_s5 + $0x8] sm:$0xff] }
 0x167   :  { %1673 = vmatprep.subr.mxu1 %v1747_v22 }
 0x168   :  { %1674 = vmatpush3.msra.mxu1 %v640_v19  ;;  %v814_v19 = vld [vmem:[%s3474_s5] sm:$0xff] }
 0x169   :  { %1675 = vmatprep.subr.mxu1 %v1747_v22 }
 0x16a   :  { %1676 = vmatpush3.msra.mxu1 %v639_v20  ;;  %v1038_v20 = vld [vmem:[%s3475_s6 + $0x350] sm:$0xff] }
 0x16b   :  { %1677 = vmatprep.subr.mxu1 %v1747_v22  ;;  %1196 = vmatprep.subr.mxu0 %v1038_v20 }
 0x16c   :  { %1678 = vmatpush3.msra.mxu1 %v638_v21  ;;  %v1040_v21 = vld [vmem:[%s3475_s6 + $0x360] sm:$0xff] }
 0x16d   :  { %859 = vmatprep.subr.mxu1 %v845_v45  ;;  %v960_v45 = vld [vmem:[%s3475_s6 + $0xe0] sm:$0xff] }
 0x20d   :  { %v1575_v36 = vpop.f32.mrf.mxu1 }
 0x20f   :  { %v1576_v38 = vpop.f32.mrf.mxu1 }
 0x210   :  { %v1577_v39 = vadd.f32 %v1576_v38, %v1575_v36  ;;  %v989_v36 = vld [vmem:[%s3475_s6 + $0x1c8] sm:$0xff]  ;;  %v982_v38 = vld [vmem:[%s3475_s6 + $0x190] sm:$0xff] }
 0x212   :  { %v634_v40 = vadd.f32 %v1577_v39, %v566_v37  ;;  %v988_v37 = vld [vmem:[%s3475_s6 + $0x1c0] sm:$0xff]  ;;  %v981_v39 = vld [vmem:[%s3475_s6 + $0x188] sm:$0xff] }
 0x214   :  { %v637_v41 = vmax.f32 %v634_v40, 0.0  ;;  %v975_v40 = vld [vmem:[%s3475_s6 + $0x158] sm:$0xff] }
 0x216   :  { %1680 = vmatmul.mubr.f32.vlgmr.msra.gmra.mxu1 %v637_v41  ;;  %v974_v41 = vld [vmem:[%s3475_s6 + $0x150] sm:$0xff] }
 0x217   :  { %923 = vmatprep.mubr.f32.mxu1 %v1747_v22  ;;  %v842_v22 = vld [vmem:[%s3474_s5 + $0xe0] sm:$0xff]  ;;  %860 = vmatpush1.msra.mxu1 %v844_v48  ;;  %v954_v48 = vld [vmem:[%s3475_s6 + $0xb0] sm:$0xff] }
 0x218   :  { %861 = vmatprep.subr.mxu1 %v843_v50  ;;  %v953_v50 = vld [vmem:[%s3475_s6 + $0xa8] sm:$0xff] }
 0x219   :  { %862 = vmatpush1.msra.mxu1 %v842_v22  ;;  %v947_v22 = vld [vmem:[%s3475_s6 + $0x78] sm:$0xff] }
 0x21a   :  { %863 = vmatprep.subr.mxu1 %v841_v51  ;;  %v946_v51 = vld [vmem:[%s3475_s6 + $0x70] sm:$0xff] }
 0x21b   :  { %864 = vmatpush1.msra.mxu1 %v840_v52  ;;  %v940_v52 = vld [vmem:[%s3475_s6 + $0x40] sm:$0xff] }
 0x21c   :  { %865 = vmatprep.subr.mxu1 %v839_v53  ;;  %v939_v53 = vld [vmem:[%s3475_s6 + $0x38] sm:$0xff] }
 0x21d   :  { %866 = vmatpush1.msra.mxu1 %v838_v54  ;;  %v933_v54 = vld [vmem:[%s3475_s6 + $0x8] sm:$0xff] }
 0x21e   :  { %867 = vmatprep.subr.mxu1 %v837_v55  ;;  %v932_v55 = vld [vmem:[%s3475_s6] sm:$0xff] }
 0x21f   :  { %868 = vmatpush1.msra.mxu1 %v836_v56  ;;  %v1150_v56 = vld [vmem:[%s3475_s6 + $0x6d0] sm:$0xff] }
 0x220   :  { %869 = vmatprep.subr.mxu1 %v835_v57  ;;  %v1149_v57 = vld [vmem:[%s3475_s6 + $0x6c8] sm:$0xff] }
 0x221   :  { %870 = vmatpush1.msra.mxu1 %v834_v58  ;;  %v1143_v58 = vld [vmem:[%s3475_s6 + $0x698] sm:$0xff] }
 0x222   :  { %871 = vmatprep.subr.mxu1 %v833_v59  ;;  %v1142_v59 = vld [vmem:[%s3475_s6 + $0x690] sm:$0xff] }
 0x223   :  { %872 = vmatpush1.msra.mxu1 %v832_v60  ;;  %v1136_v60 = vld [vmem:[%s3475_s6 + $0x660] sm:$0xff] }
 0x224   :  { %873 = vmatprep.subr.mxu1 %v831_v61  ;;  %v1135_v61 = vld [vmem:[%s3475_s6 + $0x658] sm:$0xff] }
 0x225   :  { %874 = vmatpush1.msra.mxu1 %v830_v62  ;;  %v1129_v62 = vld [vmem:[%s3475_s6 + $0x628] sm:$0xff] }
 0x226   :  { %875 = vmatprep.subr.mxu1 %v829_v63  ;;  %v1128_v63 = vld [vmem:[%s3475_s6 + $0x620] sm:$0xff] }
 0x227   :  { %876 = vmatpush1.msra.mxu1 %v828_v0  ;;  %v1122_v0 = vld [vmem:[%s3475_s6 + $0x5f0] sm:$0xff] }
 0x228   :  { %877 = vmatprep.subr.mxu1 %v827_v1  ;;  %v1121_v1 = vld [vmem:[%s3475_s6 + $0x5e8] sm:$0xff] }
 0x229   :  { %878 = vmatpush1.msra.mxu1 %v826_v2  ;;  %v1115_v2 = vld [vmem:[%s3475_s6 + $0x5b8] sm:$0xff] }
 0x22a   :  { %879 = vmatprep.subr.mxu1 %v825_v3  ;;  %v1114_v3 = vld [vmem:[%s3475_s6 + $0x5b0] sm:$0xff] }
 0x22b   :  { %880 = vmatpush1.msra.mxu1 %v824_v4  ;;  %v1108_v4 = vld [vmem:[%s3475_s6 + $0x580] sm:$0xff] }
 0x22c   :  { %881 = vmatprep.subr.mxu1 %v823_v5  ;;  %v1107_v5 = vld [vmem:[%s3475_s6 + $0x578] sm:$0xff] }
 0x22d   :  { %882 = vmatpush1.msra.mxu1 %v822_v6  ;;  %v1101_v6 = vld [vmem:[%s3475_s6 + $0x548] sm:$0xff] }
 0x22e   :  { %883 = vmatprep.subr.mxu1 %v821_v7  ;;  %v1100_v7 = vld [vmem:[%s3475_s6 + $0x540] sm:$0xff] }
 0x22f   :  { %884 = vmatpush1.msra.mxu1 %v820_v8  ;;  %v1094_v8 = vld [vmem:[%s3475_s6 + $0x510] sm:$0xff] }
 0x230   :  { %885 = vmatprep.subr.mxu1 %v819_v9  ;;  %v1093_v9 = vld [vmem:[%s3475_s6 + $0x508] sm:$0xff] }
 0x231   :  { %886 = vmatpush1.msra.mxu1 %v818_v15  ;;  %v1072_v15 = vld [vmem:[%s3475_s6 + $0x460] sm:$0xff] }
 0x232   :  { %887 = vmatprep.subr.mxu1 %v817_v16  ;;  %v1066_v16 = vld [vmem:[%s3475_s6 + $0x430] sm:$0xff] }
 0x233   :  { %888 = vmatpush1.msra.mxu1 %v816_v17  ;;  %v742_v17 = vld [vmem:[%s3471_s7 + $0x3] ss:$0 sm:$0xff] }
 0x234   :  { %889 = vmatprep.subr.mxu1 %v815_v18 }
 0x235   :  { %890 = vmatpush1.msra.mxu1 %v814_v19 }
 0x236   :  { %1267 = vmatprep.subr.mxu1 %v1040_v21 }
 0x2d6   :  { %v721_v11 = vpop.f32.mrf.mxu1 }
 0x2d7   :  { %v722_v12 = vadd.f32 %v721_v11, %v654_v10  ;;  %v1087_v10 = vld [vmem:[%s3475_s6 + $0x4d8] sm:$0xff]  ;;  %v1086_v11 = vld [vmem:[%s3475_s6 + $0x4d0] sm:$0xff] }
 0x2d8   :  { %v1681_v13 = vpop.f32.mrf.mxu1 }
 0x2d9   :  { %v725_v14 = vmax.f32 %v722_v12, 0.0  ;;  %v1080_v12 = vld [vmem:[%s3475_s6 + $0x4a0] sm:$0xff]  ;;  %v1079_v13 = vld [vmem:[%s3475_s6 + $0x498] sm:$0xff] }
 0x2db   :  { %1715 = vmatmul.mubr.f32.vlgmr.msra.gmra.mxu0 %v725_v14  ;;  %v1073_v14 = vld [vmem:[%s3475_s6 + $0x468] sm:$0xff] }
 0x2dc   :  { %1197 = vmatpush1.msra.mxu0 %v1037_v23  ;;  %v1039_v23 = vld [vmem:[%s3475_s6 + $0x358] sm:$0xff] }
 0x2dd   :  { %1198 = vmatprep.subr.mxu0 %v1031_v24  ;;  %v1033_v24 = vld [vmem:[%s3475_s6 + $0x328] sm:$0xff] }
 0x2de   :  { %1199 = vmatpush1.msra.mxu0 %v1030_v25  ;;  %v1032_v25 = vld [vmem:[%s3475_s6 + $0x320] sm:$0xff] }
 0x2df   :  { %1200 = vmatprep.subr.mxu0 %v1024_v26  ;;  %v1026_v26 = vld [vmem:[%s3475_s6 + $0x2f0] sm:$0xff] }
 0x2e0   :  { %1201 = vmatpush1.msra.mxu0 %v1023_v27  ;;  %v1025_v27 = vld [vmem:[%s3475_s6 + $0x2e8] sm:$0xff] }
 0x2e1   :  { %1202 = vmatprep.subr.mxu0 %v1017_v28  ;;  %v1019_v28 = vld [vmem:[%s3475_s6 + $0x2b8] sm:$0xff] }
 0x2e2   :  { %1203 = vmatpush1.msra.mxu0 %v1016_v29  ;;  %v1018_v29 = vld [vmem:[%s3475_s6 + $0x2b0] sm:$0xff] }
 0x2e3   :  { %1204 = vmatprep.subr.mxu0 %v1010_v30  ;;  %v1012_v30 = vld [vmem:[%s3475_s6 + $0x280] sm:$0xff] }
 0x2e4   :  { %1205 = vmatpush1.msra.mxu0 %v1009_v31  ;;  %v1011_v31 = vld [vmem:[%s3475_s6 + $0x278] sm:$0xff] }
 0x2e5   :  { %1206 = vmatprep.subr.mxu0 %v1003_v32  ;;  %v1005_v32 = vld [vmem:[%s3475_s6 + $0x248] sm:$0xff] }
 0x2e6   :  { %1207 = vmatpush1.msra.mxu0 %v1002_v33  ;;  %v1004_v33 = vld [vmem:[%s3475_s6 + $0x240] sm:$0xff] }
 0x2e7   :  { %1208 = vmatprep.subr.mxu0 %v996_v34  ;;  %v998_v34 = vld [vmem:[%s3475_s6 + $0x210] sm:$0xff] }
 0x2e8   :  { %1209 = vmatpush1.msra.mxu0 %v995_v35  ;;  %v997_v35 = vld [vmem:[%s3475_s6 + $0x208] sm:$0xff] }
 0x2e9   :  { %1210 = vmatprep.subr.mxu0 %v989_v36  ;;  %v991_v36 = vld [vmem:[%s3475_s6 + $0x1d8] sm:$0xff] }
 0x2ea   :  { %1211 = vmatpush1.msra.mxu0 %v988_v37  ;;  %v990_v37 = vld [vmem:[%s3475_s6 + $0x1d0] sm:$0xff] }
 0x2eb   :  { %1212 = vmatprep.subr.mxu0 %v982_v38  ;;  %v984_v38 = vld [vmem:[%s3475_s6 + $0x1a0] sm:$0xff] }
 0x2ec   :  { %1213 = vmatpush1.msra.mxu0 %v981_v39  ;;  %v983_v39 = vld [vmem:[%s3475_s6 + $0x198] sm:$0xff] }
 0x2ed   :  { %1214 = vmatprep.subr.mxu0 %v975_v40  ;;  %v977_v40 = vld [vmem:[%s3475_s6 + $0x168] sm:$0xff] }
 0x2ee   :  { %1215 = vmatpush1.msra.mxu0 %v974_v41  ;;  %v976_v41 = vld [vmem:[%s3475_s6 + $0x160] sm:$0xff] }
 0x2ef   :  { %1216 = vmatprep.subr.mxu0 %v968_v42  ;;  %v970_v42 = vld [vmem:[%s3475_s6 + $0x130] sm:$0xff] }
 0x2f0   :  { %1217 = vmatpush1.msra.mxu0 %v967_v43  ;;  %v969_v43 = vld [vmem:[%s3475_s6 + $0x128] sm:$0xff] }
 0x2f1   :  { %1218 = vmatprep.subr.mxu0 %v961_v44  ;;  %v963_v44 = vld [vmem:[%s3475_s6 + $0xf8] sm:$0xff] }
 0x2f2   :  { %1219 = vmatpush1.msra.mxu0 %v960_v45  ;;  %v962_v45 = vld [vmem:[%s3475_s6 + $0xf0] sm:$0xff] }
 0x2f3   :  { %1220 = vmatprep.subr.mxu0 %v954_v48  ;;  %v956_v48 = vld [vmem:[%s3475_s6 + $0xc0] sm:$0xff] }
 0x2f4   :  { %1221 = vmatpush1.msra.mxu0 %v953_v50  ;;  %v955_v50 = vld [vmem:[%s3475_s6 + $0xb8] sm:$0xff] }
 0x2f5   :  { %1222 = vmatprep.subr.mxu0 %v947_v22  ;;  %v949_v22 = vld [vmem:[%s3475_s6 + $0x88] sm:$0xff] }
 0x2f6   :  { %1223 = vmatpush1.msra.mxu0 %v946_v51  ;;  %v948_v51 = vld [vmem:[%s3475_s6 + $0x80] sm:$0xff] }
 0x2f7   :  { %1224 = vmatprep.subr.mxu0 %v940_v52  ;;  %v942_v52 = vld [vmem:[%s3475_s6 + $0x50] sm:$0xff] }
 0x2f8   :  { %1225 = vmatpush1.msra.mxu0 %v939_v53  ;;  %v941_v53 = vld [vmem:[%s3475_s6 + $0x48] sm:$0xff] }
 0x2f9   :  { %1226 = vmatprep.subr.mxu0 %v933_v54  ;;  %v935_v54 = vld [vmem:[%s3475_s6 + $0x18] sm:$0xff] }
 0x2fa   :  { %1227 = vmatpush1.msra.mxu0 %v932_v55  ;;  %v934_v55 = vld [vmem:[%s3475_s6 + $0x10] sm:$0xff] }
 0x2fb   :  { %1228 = vmatprep.subr.mxu0 %v1150_v56  ;;  %v1152_v56 = vld [vmem:[%s3475_s6 + $0x6e0] sm:$0xff] }
 0x2fc   :  { %1229 = vmatpush2.msra.mxu0 %v1149_v57  ;;  %v1151_v57 = vld [vmem:[%s3475_s6 + $0x6d8] sm:$0xff] }
 0x2fd   :  { %1230 = vmatprep.subr.mxu0 %v1143_v58  ;;  %v1145_v58 = vld [vmem:[%s3475_s6 + $0x6a8] sm:$0xff] }
 0x2fe   :  { %1231 = vmatpush2.msra.mxu0 %v1142_v59  ;;  %v1144_v59 = vld [vmem:[%s3475_s6 + $0x6a0] sm:$0xff] }
 0x2ff   :  { %1232 = vmatprep.subr.mxu0 %v1136_v60  ;;  %v1138_v60 = vld [vmem:[%s3475_s6 + $0x670] sm:$0xff] }
 0x300   :  { %1233 = vmatpush2.msra.mxu0 %v1135_v61  ;;  %v1137_v61 = vld [vmem:[%s3475_s6 + $0x668] sm:$0xff] }
 0x301   :  { %1234 = vmatprep.subr.mxu0 %v1129_v62  ;;  %v1131_v62 = vld [vmem:[%s3475_s6 + $0x638] sm:$0xff] }
 0x302   :  { %1235 = vmatpush2.msra.mxu0 %v1128_v63  ;;  %v1130_v63 = vld [vmem:[%s3475_s6 + $0x630] sm:$0xff] }
 0x303   :  { %1236 = vmatprep.subr.mxu0 %v1122_v0  ;;  %v1124_v0 = vld [vmem:[%s3475_s6 + $0x600] sm:$0xff] }
 0x304   :  { %1237 = vmatpush2.msra.mxu0 %v1121_v1  ;;  %v1123_v1 = vld [vmem:[%s3475_s6 + $0x5f8] sm:$0xff] }
 0x305   :  { %1238 = vmatprep.subr.mxu0 %v1115_v2  ;;  %v1117_v2 = vld [vmem:[%s3475_s6 + $0x5c8] sm:$0xff] }
 0x306   :  { %1239 = vmatpush2.msra.mxu0 %v1114_v3  ;;  %v1116_v3 = vld [vmem:[%s3475_s6 + $0x5c0] sm:$0xff] }
 0x307   :  { %1240 = vmatprep.subr.mxu0 %v1108_v4  ;;  %v1110_v4 = vld [vmem:[%s3475_s6 + $0x590] sm:$0xff] }
 0x308   :  { %1241 = vmatpush2.msra.mxu0 %v1107_v5  ;;  %v1109_v5 = vld [vmem:[%s3475_s6 + $0x588] sm:$0xff] }
 0x309   :  { %1242 = vmatprep.subr.mxu0 %v1101_v6  ;;  %v1103_v6 = vld [vmem:[%s3475_s6 + $0x558] sm:$0xff] }
 0x30a   :  { %1243 = vmatpush2.msra.mxu0 %v1100_v7  ;;  %v1102_v7 = vld [vmem:[%s3475_s6 + $0x550] sm:$0xff] }
 0x30b   :  { %1244 = vmatprep.subr.mxu0 %v1094_v8  ;;  %v1096_v8 = vld [vmem:[%s3475_s6 + $0x520] sm:$0xff] }
 0x30c   :  { %1245 = vmatpush2.msra.mxu0 %v1093_v9  ;;  %v1095_v9 = vld [vmem:[%s3475_s6 + $0x518] sm:$0xff] }
 0x30d   :  { %1246 = vmatprep.subr.mxu0 %v1087_v10  ;;  %v1089_v10 = vld [vmem:[%s3475_s6 + $0x4e8] sm:$0xff] }
 0x30e   :  { %1247 = vmatpush2.msra.mxu0 %v1086_v11  ;;  %v1088_v11 = vld [vmem:[%s3475_s6 + $0x4e0] sm:$0xff] }
 0x30f   :  { %1248 = vmatprep.subr.mxu0 %v1080_v12  ;;  %v1082_v12 = vld [vmem:[%s3475_s6 + $0x4b0] sm:$0xff] }
 0x310   :  { %1249 = vmatpush2.msra.mxu0 %v1079_v13  ;;  %v1081_v13 = vld [vmem:[%s3475_s6 + $0x4a8] sm:$0xff] }
 0x311   :  { %1250 = vmatprep.subr.mxu0 %v1073_v14  ;;  %v1075_v14 = vld [vmem:[%s3475_s6 + $0x478] sm:$0xff] }
 0x312   :  { %1251 = vmatpush2.msra.mxu0 %v1072_v15  ;;  %v1074_v15 = vld [vmem:[%s3475_s6 + $0x470] sm:$0xff] }
 0x313   :  { %1252 = vmatprep.subr.mxu0 %v1066_v16  ;;  %v1068_v16 = vld [vmem:[%s3475_s6 + $0x440] sm:$0xff] }
 0x39b   :  { %v809_v18 = vpop.f32.mrf.mxu0 }
 0x39c   :  { %v810_v19 = vadd.f32 %v809_v18, %v742_v17  ;;  %v1065_v17 = vld [vmem:[%s3475_s6 + $0x428] sm:$0xff]  ;;  %v1067_v18 = vld [vmem:[%s3475_s6 + $0x438] sm:$0xff] }
 0x39d   :  { %v1716_v20 = vpop.f32.mrf.mxu0  ;;  %1253 = vmatpush2.msra.mxu0 %v1065_v17  ;;  %v978_v17 = vld [vmem:[%s3475_s6 + $0x170] sm:$0xff] }
 0x39e   :  { %v813_v21 = vmax.f32 %v810_v19, 0.0  ;;  %v1059_v19 = vld [vmem:[%s3475_s6 + $0x3f8] sm:$0xff]  ;;  %v1061_v20 = vld [vmem:[%s3475_s6 + $0x408] sm:$0xff] }
 0x39f   :  { %1254 = vmatprep.subr.mxu0 %v1059_v19  ;;  %v972_v19 = vld [vmem:[%s3475_s6 + $0x140] sm:$0xff] }
 0x3a0   :  { %924 = vmatmul.mubr.f32.vlgmr.msra.gmra.mxu1 %v813_v21  ;;  %v1058_v21 = vld [vmem:[%s3475_s6 + $0x3f0] sm:$0xff] }
 0x3a1   :  { %1268 = vmatpush1.msra.mxu1 %v1039_v23  ;;  %v1060_v23 = vld [vmem:[%s3475_s6 + $0x400] sm:$0xff]  ;;  %1255 = vmatpush2.msra.mxu0 %v1058_v21  ;;  %v971_v21 = vld [vmem:[%s3475_s6 + $0x138] sm:$0xff] }
 0x3a2   :  { %1269 = vmatprep.subr.mxu1 %v1033_v24  ;;  %v1052_v24 = vld [vmem:[%s3475_s6 + $0x3c0] sm:$0xff] }
 0x3a3   :  { %1270 = vmatpush1.msra.mxu1 %v1032_v25  ;;  %v1054_v25 = vld [vmem:[%s3475_s6 + $0x3d0] sm:$0xff]  ;;  %1256 = vmatprep.subr.mxu0 %v1052_v24  ;;  %v965_v24 = vld [vmem:[%s3475_s6 + $0x108] sm:$0xff] }
 0x3a4   :  { %1271 = vmatprep.subr.mxu1 %v1026_v26  ;;  %v1051_v26 = vld [vmem:[%s3475_s6 + $0x3b8] sm:$0xff] }
 0x3a5   :  { %1272 = vmatpush1.msra.mxu1 %v1025_v27  ;;  %v1053_v27 = vld [vmem:[%s3475_s6 + $0x3c8] sm:$0xff]  ;;  %1257 = vmatpush2.msra.mxu0 %v1051_v26  ;;  %v964_v26 = vld [vmem:[%s3475_s6 + $0x100] sm:$0xff] }
 0x3a6   :  { %1273 = vmatprep.subr.mxu1 %v1019_v28  ;;  %v1045_v28 = vld [vmem:[%s3475_s6 + $0x388] sm:$0xff] }
 0x3a7   :  { %1274 = vmatpush1.msra.mxu1 %v1018_v29  ;;  %v1047_v29 = vld [vmem:[%s3475_s6 + $0x398] sm:$0xff]  ;;  %1258 = vmatprep.subr.mxu0 %v1045_v28  ;;  %v958_v28 = vld [vmem:[%s3475_s6 + $0xd0] sm:$0xff] }
 0x3a8   :  { %1275 = vmatprep.subr.mxu1 %v1012_v30  ;;  %v1044_v30 = vld [vmem:[%s3475_s6 + $0x380] sm:$0xff] }
 0x3a9   :  { %1276 = vmatpush1.msra.mxu1 %v1011_v31  ;;  %v1046_v31 = vld [vmem:[%s3475_s6 + $0x390] sm:$0xff]  ;;  %1259 = vmatpush2.msra.mxu0 %v1044_v30  ;;  %v957_v30 = vld [vmem:[%s3475_s6 + $0xc8] sm:$0xff] }
 0x3aa   :  { %1277 = vmatprep.subr.mxu1 %v1005_v32  ;;  %v1042_v32 = vld [vmem:[%s3475_s6 + $0x370] sm:$0xff] }
 0x3ab   :  { %1278 = vmatpush1.msra.mxu1 %v1004_v33  ;;  %v1155_v33 = vld [vmem:[%s3475_s6 + $0x6f8] sm:$0xff]  ;;  %1338 = vmatprep.subr.mxu0 %v1042_v32 }
 0x3ac   :  { %1279 = vmatprep.subr.mxu1 %v998_v34  ;;  %v1533_v34 = vld [vmem:[%s3471_s7 + $0x4] ss:$8 sm:$0x3]  ;;  %v951_v32 = vld [vmem:[%s3475_s6 + $0x98] sm:$0xff] }
 0x3ad   :  { %1280 = vmatpush1.msra.mxu1 %v997_v35  ;;  %v852_v35 = vrot.slane %v1533_v34, %v2506_v47 }
 0x3ae   :  { %1281 = vmatprep.subr.mxu1 %v991_v36  ;;  %v856_v36 = vrot.slane %v1533_v34, %v2512_v49  ;;  %v950_v34 = vld [vmem:[%s3475_s6 + $0x90] sm:$0xff] }
 0x3af   :  { %1282 = vmatpush1.msra.mxu1 %v990_v37 }
 0x3b0   :  { %1283 = vmatprep.subr.mxu1 %v984_v38 }
 0x3b1   :  { %1284 = vmatpush1.msra.mxu1 %v983_v39 }
 0x3b2   :  { %1285 = vmatprep.subr.mxu1 %v977_v40 }
 0x3b3   :  { %1286 = vmatpush1.msra.mxu1 %v976_v41 }
 0x3b4   :  { %1287 = vmatprep.subr.mxu1 %v970_v42 }
 0x3b5   :  { %1288 = vmatpush1.msra.mxu1 %v969_v43  ;;  %v1041_v43 = vld [vmem:[%s3475_s6 + $0x368] sm:$0xff] }
 0x3b6   :  { %1289 = vmatprep.subr.mxu1 %v963_v44  ;;  %v1043_v44 = vld [vmem:[%s3475_s6 + $0x378] sm:$0xff] }
 0x3b7   :  { %1290 = vmatpush1.msra.mxu1 %v962_v45  ;;  %v1035_v45 = vld [vmem:[%s3475_s6 + $0x338] sm:$0xff] }
 0x3b8   :  { %1291 = vmatprep.subr.mxu1 %v956_v48  ;;  %v1148_v48 = vld [vmem:[%s3475_s6 + $0x6c0] sm:$0xff] }
 0x3b9   :  { %1292 = vmatpush1.msra.mxu1 %v955_v50  ;;  %v1034_v50 = vld [vmem:[%s3475_s6 + $0x330] sm:$0xff] }
 0x3ba   :  { %1293 = vmatprep.subr.mxu1 %v949_v22  ;;  %v1036_v22 = vld [vmem:[%s3475_s6 + $0x340] sm:$0xff] }
 0x3bb   :  { %1294 = vmatpush1.msra.mxu1 %v948_v51  ;;  %v1028_v51 = vld [vmem:[%s3475_s6 + $0x300] sm:$0xff] }
 0x3bc   :  { %1295 = vmatprep.subr.mxu1 %v942_v52  ;;  %v1141_v52 = vld [vmem:[%s3475_s6 + $0x688] sm:$0xff] }
 0x3bd   :  { %1296 = vmatpush1.msra.mxu1 %v941_v53  ;;  %v1027_v53 = vld [vmem:[%s3475_s6 + $0x2f8] sm:$0xff] }
 0x3be   :  { %1297 = vmatprep.subr.mxu1 %v935_v54  ;;  %v1029_v54 = vld [vmem:[%s3475_s6 + $0x308] sm:$0xff] }
 0x3bf   :  { %1298 = vmatpush1.msra.mxu1 %v934_v55  ;;  %v1021_v55 = vld [vmem:[%s3475_s6 + $0x2c8] sm:$0xff] }
 0x3c0   :  { %1299 = vmatprep.subr.mxu1 %v1152_v56  ;;  %v1134_v56 = vld [vmem:[%s3475_s6 + $0x650] sm:$0xff] }
 0x3c1   :  { %1300 = vmatpush2.msra.mxu1 %v1151_v57  ;;  %v1020_v57 = vld [vmem:[%s3475_s6 + $0x2c0] sm:$0xff] }
 0x3c2   :  { %1301 = vmatprep.subr.mxu1 %v1145_v58  ;;  %v1022_v58 = vld [vmem:[%s3475_s6 + $0x2d0] sm:$0xff] }
 0x3c3   :  { %1302 = vmatpush2.msra.mxu1 %v1144_v59  ;;  %v1014_v59 = vld [vmem:[%s3475_s6 + $0x290] sm:$0xff] }
 0x3c4   :  { %1303 = vmatprep.subr.mxu1 %v1138_v60  ;;  %v1127_v60 = vld [vmem:[%s3475_s6 + $0x618] sm:$0xff] }
 0x3c5   :  { %1304 = vmatpush2.msra.mxu1 %v1137_v61  ;;  %v1013_v61 = vld [vmem:[%s3475_s6 + $0x288] sm:$0xff] }
 0x3c6   :  { %1305 = vmatprep.subr.mxu1 %v1131_v62  ;;  %v1015_v62 = vld [vmem:[%s3475_s6 + $0x298] sm:$0xff] }
 0x3c7   :  { %1306 = vmatpush2.msra.mxu1 %v1130_v63  ;;  %v1007_v63 = vld [vmem:[%s3475_s6 + $0x258] sm:$0xff] }
 0x3c8   :  { %1307 = vmatprep.subr.mxu1 %v1124_v0  ;;  %v1120_v0 = vld [vmem:[%s3475_s6 + $0x5e0] sm:$0xff] }
 0x3c9   :  { %1308 = vmatpush2.msra.mxu1 %v1123_v1  ;;  %v1006_v1 = vld [vmem:[%s3475_s6 + $0x250] sm:$0xff] }
 0x3ca   :  { %1309 = vmatprep.subr.mxu1 %v1117_v2  ;;  %v1008_v2 = vld [vmem:[%s3475_s6 + $0x260] sm:$0xff] }
 0x3cb   :  { %1310 = vmatpush2.msra.mxu1 %v1116_v3  ;;  %v1000_v3 = vld [vmem:[%s3475_s6 + $0x220] sm:$0xff] }
 0x3cc   :  { %1311 = vmatprep.subr.mxu1 %v1110_v4  ;;  %v1113_v4 = vld [vmem:[%s3475_s6 + $0x5a8] sm:$0xff] }
 0x3cd   :  { %1312 = vmatpush2.msra.mxu1 %v1109_v5  ;;  %v999_v5 = vld [vmem:[%s3475_s6 + $0x218] sm:$0xff] }
 0x3ce   :  { %1313 = vmatprep.subr.mxu1 %v1103_v6  ;;  %v1001_v6 = vld [vmem:[%s3475_s6 + $0x228] sm:$0xff] }
 0x3cf   :  { %1314 = vmatpush2.msra.mxu1 %v1102_v7  ;;  %v993_v7 = vld [vmem:[%s3475_s6 + $0x1e8] sm:$0xff] }
 0x3d0   :  { %1315 = vmatprep.subr.mxu1 %v1096_v8  ;;  %v1106_v8 = vld [vmem:[%s3475_s6 + $0x570] sm:$0xff] }
 0x3d1   :  { %1316 = vmatpush2.msra.mxu1 %v1095_v9  ;;  %v992_v9 = vld [vmem:[%s3475_s6 + $0x1e0] sm:$0xff] }
 0x3d2   :  { %1317 = vmatprep.subr.mxu1 %v1089_v10  ;;  %v994_v10 = vld [vmem:[%s3475_s6 + $0x1f0] sm:$0xff] }
 0x3d3   :  { %1318 = vmatpush2.msra.mxu1 %v1088_v11  ;;  %v986_v11 = vld [vmem:[%s3475_s6 + $0x1b0] sm:$0xff] }
 0x3d4   :  { %1319 = vmatprep.subr.mxu1 %v1082_v12  ;;  %v1099_v12 = vld [vmem:[%s3475_s6 + $0x538] sm:$0xff] }
 0x3d5   :  { %1320 = vmatpush2.msra.mxu1 %v1081_v13  ;;  %v985_v13 = vld [vmem:[%s3475_s6 + $0x1a8] sm:$0xff] }
 0x3d6   :  { %1321 = vmatprep.subr.mxu1 %v1075_v14  ;;  %v987_v14 = vld [vmem:[%s3475_s6 + $0x1b8] sm:$0xff] }
 0x3d7   :  { %1322 = vmatpush2.msra.mxu1 %v1074_v15  ;;  %v979_v15 = vld [vmem:[%s3475_s6 + $0x178] sm:$0xff] }
 0x3d8   :  { %1323 = vmatprep.subr.mxu1 %v1068_v16  ;;  %v1092_v16 = vld [vmem:[%s3475_s6 + $0x500] sm:$0xff] }
 0x3d9   :  { %1324 = vmatpush2.msra.mxu1 %v1067_v18  ;;  %v980_v18 = vld [vmem:[%s3475_s6 + $0x180] sm:$0xff] }
 0x3da   :  { %1325 = vmatprep.subr.mxu1 %v1061_v20  ;;  %v1085_v20 = vld [vmem:[%s3475_s6 + $0x4c8] sm:$0xff] }
 0x3db   :  { %1326 = vmatpush2.msra.mxu1 %v1060_v23  ;;  %v973_v23 = vld [vmem:[%s3475_s6 + $0x148] sm:$0xff] }
 0x3dc   :  { %1327 = vmatprep.subr.mxu1 %v1054_v25  ;;  %v1078_v25 = vld [vmem:[%s3475_s6 + $0x490] sm:$0xff] }
 0x3dd   :  { %1328 = vmatpush2.msra.mxu1 %v1053_v27  ;;  %v966_v27 = vld [vmem:[%s3475_s6 + $0x110] sm:$0xff] }
 0x3de   :  { %1329 = vmatprep.subr.mxu1 %v1047_v29  ;;  %v1071_v29 = vld [vmem:[%s3475_s6 + $0x458] sm:$0xff] }
 0x3df   :  { %1330 = vmatpush2.msra.mxu1 %v1046_v31  ;;  %v959_v31 = vld [vmem:[%s3475_s6 + $0xd8] sm:$0xff] }
 0x3e0   :  { %1612 = vmatprep.subr.mxu1 %v1155_v33  ;;  %v1064_v33 = vld [vmem:[%s3475_s6 + $0x420] sm:$0xff] }
 0x460   :  { %v925_v37 = vpop.f32.mrf.mxu1 }
 0x461   :  { %v926_v38 = vadd.f32 %v925_v37, %v852_v35  ;;  %v952_v35 = vld [vmem:[%s3475_s6 + $0xa0] sm:$0xff]  ;;  %v1057_v37 = vld [vmem:[%s3475_s6 + $0x3e8] sm:$0xff] }
 0x462   :  { %v927_v39 = vpop.f32.mrf.mxu1 }
 0x463   :  { %v928_v40 = vadd.f32 %v927_v39, %v856_v36  ;;  %v3145_v42 = vmax.f32 %v926_v38, 0.0  ;;  %v944_v36 = vld [vmem:[%s3475_s6 + $0x60] sm:$0xff]  ;;  %v943_v38 = vld [vmem:[%s3475_s6 + $0x58] sm:$0xff]  ;;  %v945_v39 = vld [vmem:[%s3475_s6 + $0x68] sm:$0xff] }
 0x465   :  { %v931_v41 = vmax.f32 %v928_v40, 0.0  ;;  %v937_v40 = vld [vmem:[%s3475_s6 + $0x28] sm:$0xff] }
 0x467   :  { %1260 = vmatprep.mubr.f32.mxu0 %v931_v41  ;;  %1331 = vmatprep.mubr.f32.mxu1 %v931_v41 }
 0x468   :  { %1261 = vmatmul.mubr.f32.vlgmr.msra.gmra.mxu0 %v3145_v42  ;;  %1332 = vmatmul.mubr.f32.vlgmr.msra.gmra.mxu1 %v3145_v42 }
 0x469   :  { %1339 = vmatpush1.msra.mxu0 %v1041_v43  ;;  %1613 = vmatpush3.msra.mxu1 %v1043_v44  ;;  %v936_v43 = vld [vmem:[%s3475_s6 + $0x20] sm:$0xff]  ;;  %v938_v44 = vld [vmem:[%s3475_s6 + $0x30] sm:$0xff] }
 0x46a   :  { %1340 = vmatprep.subr.mxu0 %v1035_v45  ;;  %1402 = vmatprep.mubr.f32.mxu0 %v931_v41  ;;  %v1154_v45 = vld [vmem:[%s3475_s6 + $0x6f0] sm:$0xff] }
 0x46b   :  { %1614 = vmatprep.subr.mxu1 %v1148_v48  ;;  %1473 = vmatprep.mubr.f32.mxu1 %v931_v41  ;;  %v1050_v41 = vld [vmem:[%s3475_s6 + $0x3b0] sm:$0xff]  ;;  %v1153_v48 = vld [vmem:[%s3475_s6 + $0x6e8] sm:$0xff] }
 0x46c   :  { %1341 = vmatpush1.msra.mxu0 %v1034_v50  ;;  %1615 = vmatpush3.msra.mxu1 %v1036_v22  ;;  %v1147_v50 = vld [vmem:[%s3475_s6 + $0x6b8] sm:$0xff]  ;;  %v1146_v22 = vld [vmem:[%s3475_s6 + $0x6b0] sm:$0xff] }
 0x46d   :  { %1342 = vmatprep.subr.mxu0 %v1028_v51  ;;  %1616 = vmatprep.subr.mxu1 %v1141_v52  ;;  %v1140_v51 = vld [vmem:[%s3475_s6 + $0x680] sm:$0xff]  ;;  %v1139_v52 = vld [vmem:[%s3475_s6 + $0x678] sm:$0xff] }
 0x46e   :  { %1343 = vmatpush1.msra.mxu0 %v1027_v53  ;;  %1617 = vmatpush3.msra.mxu1 %v1029_v54  ;;  %v1133_v53 = vld [vmem:[%s3475_s6 + $0x648] sm:$0xff]  ;;  %v1132_v54 = vld [vmem:[%s3475_s6 + $0x640] sm:$0xff] }
 0x46f   :  { %1344 = vmatprep.subr.mxu0 %v1021_v55  ;;  %1618 = vmatprep.subr.mxu1 %v1134_v56  ;;  %v1126_v55 = vld [vmem:[%s3475_s6 + $0x610] sm:$0xff]  ;;  %v1125_v56 = vld [vmem:[%s3475_s6 + $0x608] sm:$0xff] }
 0x470   :  { %1345 = vmatpush1.msra.mxu0 %v1020_v57  ;;  %1619 = vmatpush3.msra.mxu1 %v1022_v58  ;;  %v1119_v57 = vld [vmem:[%s3475_s6 + $0x5d8] sm:$0xff]  ;;  %v1118_v58 = vld [vmem:[%s3475_s6 + $0x5d0] sm:$0xff] }
 0x471   :  { %1346 = vmatprep.subr.mxu0 %v1014_v59  ;;  %1620 = vmatprep.subr.mxu1 %v1127_v60  ;;  %v1112_v59 = vld [vmem:[%s3475_s6 + $0x5a0] sm:$0xff]  ;;  %v1111_v60 = vld [vmem:[%s3475_s6 + $0x598] sm:$0xff] }
 0x472   :  { %1347 = vmatpush1.msra.mxu0 %v1013_v61  ;;  %1621 = vmatpush3.msra.mxu1 %v1015_v62  ;;  %v1105_v61 = vld [vmem:[%s3475_s6 + $0x568] sm:$0xff]  ;;  %v1104_v62 = vld [vmem:[%s3475_s6 + $0x560] sm:$0xff] }
 0x473   :  { %1348 = vmatprep.subr.mxu0 %v1007_v63  ;;  %1622 = vmatprep.subr.mxu1 %v1120_v0  ;;  %v1098_v63 = vld [vmem:[%s3475_s6 + $0x530] sm:$0xff]  ;;  %v1097_v0 = vld [vmem:[%s3475_s6 + $0x528] sm:$0xff] }
 0x474   :  { %1349 = vmatpush1.msra.mxu0 %v1006_v1  ;;  %1623 = vmatpush3.msra.mxu1 %v1008_v2  ;;  %v1091_v1 = vld [vmem:[%s3475_s6 + $0x4f8] sm:$0xff]  ;;  %v1090_v2 = vld [vmem:[%s3475_s6 + $0x4f0] sm:$0xff] }
 0x475   :  { %1350 = vmatprep.subr.mxu0 %v1000_v3  ;;  %1624 = vmatprep.subr.mxu1 %v1113_v4  ;;  %v1084_v3 = vld [vmem:[%s3475_s6 + $0x4c0] sm:$0xff]  ;;  %v1083_v4 = vld [vmem:[%s3475_s6 + $0x4b8] sm:$0xff] }
 0x476   :  { %1351 = vmatpush1.msra.mxu0 %v999_v5  ;;  %1625 = vmatpush3.msra.mxu1 %v1001_v6  ;;  %v1077_v5 = vld [vmem:[%s3475_s6 + $0x488] sm:$0xff]  ;;  %v1076_v6 = vld [vmem:[%s3475_s6 + $0x480] sm:$0xff] }
 0x477   :  { %1352 = vmatprep.subr.mxu0 %v993_v7  ;;  %1626 = vmatprep.subr.mxu1 %v1106_v8  ;;  %v1070_v7 = vld [vmem:[%s3475_s6 + $0x450] sm:$0xff]  ;;  %v1069_v8 = vld [vmem:[%s3475_s6 + $0x448] sm:$0xff] }
 0x478   :  { %1353 = vmatpush1.msra.mxu0 %v992_v9  ;;  %1627 = vmatpush3.msra.mxu1 %v994_v10  ;;  %v1063_v9 = vld [vmem:[%s3475_s6 + $0x418] sm:$0xff]  ;;  %v1062_v10 = vld [vmem:[%s3475_s6 + $0x410] sm:$0xff] }
 0x479   :  { %1354 = vmatprep.subr.mxu0 %v986_v11  ;;  %1628 = vmatprep.subr.mxu1 %v1099_v12  ;;  %v1056_v11 = vld [vmem:[%s3475_s6 + $0x3e0] sm:$0xff]  ;;  %v1055_v12 = vld [vmem:[%s3475_s6 + $0x3d8] sm:$0xff] }
 0x47a   :  { %1355 = vmatpush1.msra.mxu0 %v985_v13  ;;  %1629 = vmatpush3.msra.mxu1 %v987_v14  ;;  %v1049_v13 = vld [vmem:[%s3475_s6 + $0x3a8] sm:$0xff]  ;;  %v1048_v14 = vld [vmem:[%s3475_s6 + $0x3a0] sm:$0xff] }
 0x47b   :  { %1356 = vmatprep.subr.mxu0 %v979_v15  ;;  %1630 = vmatprep.subr.mxu1 %v1092_v16  ;;  %v1534_v15 = vld [vmem:[%s3471_s7 + $0x5] ss:$8 sm:$0xf] }
 0x47c   :  { %1357 = vmatpush1.msra.mxu0 %v978_v17  ;;  %1631 = vmatpush3.msra.mxu1 %v980_v18  ;;  %v1535_v16 = vld [vmem:[%s3471_s7 + $0x5] ss:$8 sm:$0x70]  ;;  %v1171_v18 = vsub.s32 2, %v2503_v46 }
 0x47d   :  { %1358 = vmatprep.subr.mxu0 %v972_v19  ;;  %1632 = vmatprep.subr.mxu1 %v1085_v20  ;;  %v1159_v17 = vor.u32 %v1535_v16, %v1534_v15  ;;  %v1175_v19 = vsub.s32 3, %v2503_v46 }
 0x47e   :  { %1359 = vmatpush1.msra.mxu0 %v971_v21  ;;  %1633 = vmatpush3.msra.mxu1 %v973_v23 }
 0x47f   :  { %1360 = vmatprep.subr.mxu0 %v965_v24  ;;  %1634 = vmatprep.subr.mxu1 %v1078_v25  ;;  %v1164_v20 = vrot.slane %v1159_v17, %v2506_v47  ;;  %v1172_v21 = vrot.slane %v1159_v17, %v1171_v18  ;;  %v1168_v23 = vrot.slane %v1159_v17, %v2512_v49 }
 0x480   :  { %1361 = vmatpush1.msra.mxu0 %v964_v26  ;;  %1635 = vmatpush3.msra.mxu1 %v966_v27  ;;  %v1176_v24 = vrot.slane %v1159_v17, %v1175_v19 }
 0x481   :  { %1362 = vmatprep.subr.mxu0 %v958_v28  ;;  %1636 = vmatprep.subr.mxu1 %v1071_v29 }
 0x482   :  { %1363 = vmatpush1.msra.mxu0 %v957_v30  ;;  %1637 = vmatpush3.msra.mxu1 %v959_v31 }
 0x483   :  { %1364 = vmatprep.subr.mxu0 %v951_v32  ;;  %1638 = vmatprep.subr.mxu1 %v1064_v33 }
 0x484   :  { %1365 = vmatpush1.msra.mxu0 %v950_v34  ;;  %1639 = vmatpush3.msra.mxu1 %v952_v35 }
 0x485   :  { %1366 = vmatprep.subr.mxu0 %v944_v36  ;;  %1640 = vmatprep.subr.mxu1 %v1057_v37 }
 0x486   :  { %1367 = vmatpush1.msra.mxu0 %v943_v38  ;;  %1641 = vmatpush3.msra.mxu1 %v945_v39 }
 0x487   :  { %1368 = vmatprep.subr.mxu0 %v937_v40  ;;  %1642 = vmatprep.subr.mxu1 %v1050_v41 }
 0x488   :  { %1369 = vmatpush1.msra.mxu0 %v936_v43  ;;  %1643 = vmatpush3.msra.mxu1 %v938_v44  ;;  %v1187_v43 = vsub.s32 6, %v2503_v46 }
 0x489   :  { %1370 = vmatprep.subr.mxu0 %v1154_v45  ;;  %1474 = vmatmul.mubr.f32.vlgmr.msra.gmra.mxu1 %v3145_v42 }
 0x48a   :  { %1371 = vmatpush2.msra.mxu0 %v1153_v48  ;;  %v1188_v48 = vrot.slane %v1159_v17, %v1187_v43 }
 0x48b   :  { %1372 = vmatprep.subr.mxu0 %v1147_v50 }
 0x48c   :  { %1373 = vmatpush2.msra.mxu0 %v1146_v22 }
 0x48d   :  { %1374 = vmatprep.subr.mxu0 %v1140_v51 }
 0x48e   :  { %1375 = vmatpush2.msra.mxu0 %v1139_v52 }
 0x48f   :  { %1376 = vmatprep.subr.mxu0 %v1133_v53 }
 0x490   :  { %1377 = vmatpush2.msra.mxu0 %v1132_v54 }
 0x491   :  { %1378 = vmatprep.subr.mxu0 %v1126_v55 }
 0x492   :  { %1379 = vmatpush2.msra.mxu0 %v1125_v56 }
 0x493   :  { %1380 = vmatprep.subr.mxu0 %v1119_v57 }
 0x494   :  { %1381 = vmatpush2.msra.mxu0 %v1118_v58  ;;  %v1179_v58 = vsub.s32 4, %v2503_v46 }
 0x495   :  { %1382 = vmatprep.subr.mxu0 %v1112_v59  ;;  %v1183_v59 = vsub.s32 5, %v2503_v46 }
 0x496   :  { %1383 = vmatpush2.msra.mxu0 %v1111_v60  ;;  %v1180_v60 = vrot.slane %v1159_v17, %v1179_v58 }
 0x497   :  { %1384 = vmatprep.subr.mxu0 %v1105_v61  ;;  %v1184_v61 = vrot.slane %v1159_v17, %v1183_v59 }
 0x498   :  { %1385 = vmatpush2.msra.mxu0 %v1104_v62 }
 0x499   :  { %1386 = vmatprep.subr.mxu0 %v1098_v63 }
 0x49a   :  { %1387 = vmatpush2.msra.mxu0 %v1097_v0 }
 0x49b   :  { %1388 = vmatprep.subr.mxu0 %v1091_v1 }
 0x49c   :  { %1389 = vmatpush2.msra.mxu0 %v1090_v2 }
 0x49d   :  { %1390 = vmatprep.subr.mxu0 %v1084_v3 }
 0x49e   :  { %1391 = vmatpush2.msra.mxu0 %v1083_v4 }
 0x49f   :  { %1392 = vmatprep.subr.mxu0 %v1077_v5 }
 0x4a0   :  { %1393 = vmatpush2.msra.mxu0 %v1076_v6 }
 0x4a1   :  { %1394 = vmatprep.subr.mxu0 %v1070_v7 }
 0x4a2   :  { %1395 = vmatpush2.msra.mxu0 %v1069_v8 }
 0x4a3   :  { %1396 = vmatprep.subr.mxu0 %v1063_v9 }
 0x4a4   :  { %1397 = vmatpush2.msra.mxu0 %v1062_v10 }
 0x4a5   :  { %1398 = vmatprep.subr.mxu0 %v1056_v11 }
 0x4a6   :  { %1399 = vmatpush2.msra.mxu0 %v1055_v12 }
 0x4a7   :  { %1400 = vmatprep.subr.mxu0 %v1049_v13 }
 0x4a8   :  { %1401 = vmatpush2.msra.mxu0 %v1048_v14 }
 0x4a9   :  { %1403 = vmatmul.mubr.f32.vlgmr.msra.gmra.mxu0 %v3145_v42 }
 0x528   :  { %v1262_v42 = vpop.f32.mrf.mxu0  ;;  %v1333_v25 = vpop.f32.mrf.mxu1 }
 0x529   :  { %v1263_v26 = vadd.f32 %v1262_v42, %v1164_v20  ;;  %v1334_v27 = vadd.f32 %v1333_v25, %v1172_v21 }
 0x52a   :  { %v1264_v28 = vpop.f32.mrf.mxu0  ;;  %v1335_v29 = vpop.f32.mrf.mxu1 }
 0x52b   :  { %v1536_v30 = vmul.f32 -1.442695, %v1263_v26  ;;  %v1538_v31 = vmul.f32 -1.442695, %v1334_v27  ;;  %v1265_v32 = vadd.f32 %v1264_v28, %v1168_v23  ;;  %v1336_v33 = vadd.f32 %v1335_v29, %v1176_v24 }
 0x52d   :  { %1719 = vpow2.f32 %v1536_v30  ;;  %v1537_v34 = vmul.f32 -1.442695, %v1265_v32  ;;  %v1539_v35 = vmul.f32 -1.442695, %v1336_v33 }
 0x52e   :  { %1721 = vpow2.f32 %v1538_v31 }
 0x52f   :  { %1723 = vpow2.f32 %v1537_v34 }
 0x530   :  { %1725 = vpow2.f32 %v1539_v35 }
 0x53a   :  { %v1720_v47 = vpop.eup %1719 }
 0x53b   :  { %v1722_v36 = vpop.eup %1721  ;;  %v1500_v49 = vadd.f32 1.0, %v1720_v47 }
 0x53c   :  { %v1724_v37 = vpop.eup %1723  ;;  %v1502_v38 = vadd.f32 1.0, %v1722_v36 }
 0x53d   :  { %v1726_v39 = vpop.eup %1725  ;;  %1727 = vrcp.f32 %v1500_v49  ;;  %v1501_v40 = vadd.f32 1.0, %v1724_v37 }
 0x53e   :  { %1729 = vrcp.f32 %v1502_v38  ;;  %v1503_v41 = vadd.f32 1.0, %v1726_v39 }
 0x53f   :  { %1731 = vrcp.f32 %v1501_v40 }
 0x540   :  { %1733 = vrcp.f32 %v1503_v41 }
 0x549   :  { %v1644_v44 = vpop.f32.mrf.mxu1 }
 0x54a   :  { %v1728_v45 = vpop.eup %1727 }
 0x54b   :  { %v1730_v50 = vpop.eup %1729  ;;  %1521 = vst [vmem:[%s3476_s8] sm:$0xff] %v1728_v45  ;;  %v1645_v22 = vpop.f32.mrf.mxu1 }
 0x54c   :  { %v1732_v51 = vpop.eup %1731  ;;  %1523 = vst [vmem:[%s3476_s8 + $0x10] sm:$0xff] %v1730_v50  ;;  %v1646_v52 = vadd.f32 %v1645_v22, %v1644_v44 }
 0x54d   :  { %v1734_v53 = vpop.eup %1733  ;;  %1522 = vst [vmem:[%s3476_s8 + $0x8] sm:$0xff] %v1732_v51 }
 0x54e   :  { %1524 = vst [vmem:[%s3476_s8 + $0x18] sm:$0xff] %v1734_v53  ;;  %v1476_v54 = vadd.f32 %v1646_v52, %v1188_v48 }
 0x550   :  { %v1542_v55 = vmul.f32 -1.442695, %v1476_v54 }
 0x552   :  { %1735 = vpow2.f32 %v1542_v55 }
 0x55f   :  { %v1736_v56 = vpop.eup %1735 }
 0x560   :  { %v1506_v57 = vadd.f32 1.0, %v1736_v56 }
 0x562   :  { %1737 = vrcp.f32 %v1506_v57 }
 0x569   :  { %v1404_v62 = vpop.f32.mrf.mxu0 }
 0x56a   :  { %v1405_v63 = vadd.f32 %v1404_v62, %v1180_v60 }
 0x56b   :  { %v1406_v0 = vpop.f32.mrf.mxu0 }
 0x56c   :  { %v1540_v1 = vmul.f32 -1.442695, %v1405_v63  ;;  %v1407_v2 = vadd.f32 %v1406_v0, %v1184_v61 }
 0x56e   :  { %1739 = vpow2.f32 %v1540_v1  ;;  %v1541_v3 = vmul.f32 -1.442695, %v1407_v2 }
 0x56f   :  { %v1738_v4 = vpop.eup %1737 }
 0x570   :  { %1527 = vst.msk [vmem:[%s3476_s8 + $0x30] sm:$0xff] %vm244_vm0, %v1738_v4  ;;  %1741 = vpow2.f32 %v1541_v3 }
 0x57b   :  { %v1740_v5 = vpop.eup %1739 }
 0x57c   :  { %v1504_v6 = vadd.f32 1.0, %v1740_v5 }
 0x57d   :  { %v1742_v7 = vpop.eup %1741 }
 0x57e   :  { %1743 = vrcp.f32 %v1504_v6  ;;  %v1505_v46 = vadd.f32 1.0, %v1742_v7 }
 0x580   :  { %1745 = vrcp.f32 %v1505_v46 }
 0x58b   :  { %v1744_v8 = vpop.eup %1743 }
 0x58c   :  { %1525 = vst [vmem:[%s3476_s8 + $0x20] sm:$0xff] %v1744_v8 }
 0x58d   :  { %v1746_v9 = vpop.eup %1745 }
 0x58e   :  { %1526 = vst [vmem:[%s3476_s8 + $0x28] sm:$0xff] %v1746_v9 }

</bundles_post_ra>
